<compile_context>
chip_gen: v7x
topology: tpu7x:2x2x1
jax: 0.10.0
libtpu: 0.0.40
codegen_flags: <defaults>
</compile_context>

<pallas_src>
import numpy as np
import jax
import jax.numpy as jnp
from jax.experimental import pallas as pl
from jax.experimental.pallas import tpu as pltpu

_CompilerParams = getattr(pltpu, "CompilerParams", None) or getattr(
    pltpu, "TPUCompilerParams", None)


# ----------------------------------------------------------------------------
# Fused LeNet kernel (one grid step == one batch sample)
# ----------------------------------------------------------------------------
def _lenet_kernel(x_ref, cb1_ref, b1e_ref, cb2_ref, b2e_ref,
                  wfc1_ref, bfc1_ref, wfc2_ref, bfc2_ref, wfc3_ref, bfc3_ref,
                  out_ref, a1s_ref, a2s_ref):
    f32 = jnp.float32
    bf16 = jnp.bfloat16

    def conv_pool(src_ref, band_ref, bias_ref, rows_out, ksize=5):
        """conv(kxk, stride1) + bias + ReLU + 2x2 maxpool, fully in VMEM.

        src_ref : (H_in, L_in)  activation rows, lanes = (C_in, W_in)
        band_ref: (2, k, L_in, L_out) banded conv weights (bf16), one slab per
                  (output-column parity, kernel-row offset)
        returns : (rows_out, L_out) with L_out lanes = (C_out, W_out/2)
        """
        pooled = None
        for rp in range(2):                      # output-row parity
            slabs = [
                src_ref[pl.ds(di + rp, rows_out, 2), :].astype(bf16)
                for di in range(ksize)
            ]
            for cp in range(2):                  # output-column parity
                acc = jnp.dot(slabs[0], band_ref[cp, 0],
                              preferred_element_type=f32)
                for di in range(1, ksize):
                    acc = acc + jnp.dot(slabs[di], band_ref[cp, di],
                                        preferred_element_type=f32)
                pooled = acc if pooled is None else jnp.maximum(pooled, acc)
        # bias + ReLU commute with max-pool (bias is per-channel constant).
        return jnp.maximum(pooled + bias_ref[...], 0.0)

    # Stage 1: conv1(3->6, k5, pad2) + ReLU + pool   : (36,108) -> (16,96)
    a1s_ref[...] = conv_pool(x_ref, cb1_ref, b1e_ref, 16)
    # Stage 2: conv2(6->16, k5, pad0) + ReLU + pool  : (16,96)  -> (6,96)
    a2s_ref[...] = conv_pool(a1s_ref, cb2_ref, b2e_ref, 6)

    # FC head.  The channel-major flatten is folded into wfc1's row order
    # (done at init); fc1 is accumulated row-by-row so no in-kernel reshape.
    z = jnp.dot(a2s_ref[pl.ds(0, 1), :].astype(bf16),
                wfc1_ref[pl.ds(0, 96), :], preferred_element_type=f32)
    for h in range(1, 6):
        z = z + jnp.dot(a2s_ref[pl.ds(h, 1), :].astype(bf16),
                        wfc1_ref[pl.ds(h * 96, 96), :],
                        preferred_element_type=f32)
    z = jnp.maximum(z + bfc1_ref[...], 0.0)
    z = jnp.maximum(jnp.dot(z.astype(bf16), wfc2_ref[...],
                            preferred_element_type=f32) + bfc2_ref[...], 0.0)
    z = jnp.dot(z.astype(bf16), wfc3_ref[...],
                preferred_element_type=f32) + bfc3_ref[...]
    out_ref[...] = z


# ----------------------------------------------------------------------------
# Parameters: PyTorch-layout init + one-time re-layout for the fused kernel
# ----------------------------------------------------------------------------
def init_lenet_params(key, num_classes=10):
    ks = jax.random.split(key, 10)

    def w(k, shape, fan_in):
        return (jax.random.normal(k, shape, jnp.float32) /
                jnp.sqrt(fan_in)).astype(jnp.float32)

    return {
        "conv1_w": w(ks[0], (6, 3, 5, 5), 3 * 5 * 5),
        "conv1_b": 0.01 * jax.random.normal(ks[1], (6,), jnp.float32),
        "conv2_w": w(ks[2], (16, 6, 5, 5), 6 * 5 * 5),
        "conv2_b": 0.01 * jax.random.normal(ks[3], (16,), jnp.float32),
        "fc1_w": w(ks[4], (120, 16 * 6 * 6), 16 * 6 * 6),
        "fc1_b": 0.01 * jax.random.normal(ks[5], (120,), jnp.float32),
        "fc2_w": w(ks[6], (84, 120), 120),
        "fc2_b": 0.01 * jax.random.normal(ks[7], (84,), jnp.float32),
        "fc3_w": w(ks[8], (num_classes, 84), 84),
        "fc3_b": 0.01 * jax.random.normal(ks[9], (num_classes,), jnp.float32),
    }


def prepare_params(params):
    """One-time (init) re-layout of PyTorch-style LeNet params for the kernel."""
    w1 = np.asarray(params["conv1_w"], np.float32)   # (6,3,5,5)
    b1 = np.asarray(params["conv1_b"], np.float32)
    w2 = np.asarray(params["conv2_w"], np.float32)   # (16,6,5,5)
    b2 = np.asarray(params["conv2_b"], np.float32)
    fw1 = np.asarray(params["fc1_w"], np.float32)    # (120,576)
    fb1 = np.asarray(params["fc1_b"], np.float32)
    fw2 = np.asarray(params["fc2_w"], np.float32)    # (84,120)
    fb2 = np.asarray(params["fc2_b"], np.float32)
    fw3 = np.asarray(params["fc3_w"], np.float32)    # (nc,84)
    fb3 = np.asarray(params["fc3_b"], np.float32)

    # conv1 banded weights: input lane = c*36 + wp, output col = co*16 + wh,
    # output column w = 2*wh + p (p = column parity), one band per kernel row.
    cb1 = np.zeros((2, 5, 3 * 36, 6 * 16), np.float32)
    wh = np.arange(16)
    for p in range(2):
        for di in range(5):
            for dj in range(5):
                for c in range(3):
                    rows = c * 36 + 2 * wh + p + dj
                    for co in range(6):
                        cb1[p, di, rows, co * 16 + wh] = w1[co, c, di, dj]

    # conv2 banded weights: input lane = c*16 + wp, output col = co*6 + wh.
    cb2 = np.zeros((2, 5, 6 * 16, 16 * 6), np.float32)
    wh = np.arange(6)
    for p in range(2):
        for di in range(5):
            for dj in range(5):
                for c in range(6):
                    rows = c * 16 + 2 * wh + p + dj
                    for co in range(16):
                        cb2[p, di, rows, co * 6 + wh] = w2[co, c, di, dj]

    # fc1: permute from torch's channel-major flatten (co,h,w) to the kernel's
    # activation layout (h, co, w); store transposed as (576, 120).
    wfc1 = np.zeros((576, 120), np.float32)
    for h in range(6):
        for co in range(16):
            for w_ in range(6):
                wfc1[h * 96 + co * 6 + w_, :] = fw1[:, co * 36 + h * 6 + w_]

    bf16 = jnp.bfloat16
    return {
        "cb1": jnp.asarray(cb1, bf16),
        "b1e": jnp.asarray(np.repeat(b1, 16)[None, :], jnp.float32),
        "cb2": jnp.asarray(cb2, bf16),
        "b2e": jnp.asarray(np.repeat(b2, 6)[None, :], jnp.float32),
        "wfc1": jnp.asarray(wfc1, bf16),
        "bfc1": jnp.asarray(fb1[None, :], jnp.float32),
        "wfc2": jnp.asarray(fw2.T, bf16),
        "bfc2": jnp.asarray(fb2[None, :], jnp.float32),
        "wfc3": jnp.asarray(fw3.T, bf16),
        "bfc3": jnp.asarray(fb3[None, :], jnp.float32),
    }


# ----------------------------------------------------------------------------
# Forward: one pallas_call for the whole network
# ----------------------------------------------------------------------------
def lenet_forward(prep, x):
    # x: (N, 3, 32, 32) float32 (NCHW, PyTorch layout)
    n = x.shape[0]
    nc = prep["bfc3"].shape[1]

    # Only per-forward XLA glue: pad to 36x36 and lay rows=H, lanes=(C, W).
    xp = jnp.pad(x, ((0, 0), (0, 0), (2, 2), (2, 2)))           # (N,3,36,36)
    xp = jnp.transpose(xp, (0, 2, 1, 3)).reshape(n, 36, 108)    # (N,36,108)

    cp = (_CompilerParams(dimension_semantics=("parallel",))
          if _CompilerParams is not None else None)

    out = pl.pallas_call(
        _lenet_kernel,
        out_shape=jax.ShapeDtypeStruct((n, 1, nc), jnp.float32),
        grid=(n,),
        in_specs=[
            pl.BlockSpec((None, 36, 108), lambda i: (i, 0, 0)),      # x (per sample)
            pl.BlockSpec((2, 5, 108, 96), lambda i: (0, 0, 0, 0)),   # conv1 bands
            pl.BlockSpec((1, 96), lambda i: (0, 0)),                 # conv1 bias (expanded)
            pl.BlockSpec((2, 5, 96, 96), lambda i: (0, 0, 0, 0)),    # conv2 bands
            pl.BlockSpec((1, 96), lambda i: (0, 0)),                 # conv2 bias (expanded)
            pl.BlockSpec((576, 120), lambda i: (0, 0)),              # fc1 weight (permuted)
            pl.BlockSpec((1, 120), lambda i: (0, 0)),                # fc1 bias
            pl.BlockSpec((120, 84), lambda i: (0, 0)),               # fc2 weight
            pl.BlockSpec((1, 84), lambda i: (0, 0)),                 # fc2 bias
            pl.BlockSpec((84, nc), lambda i: (0, 0)),                # fc3 weight
            pl.BlockSpec((1, nc), lambda i: (0, 0)),                 # fc3 bias
        ],
        out_specs=pl.BlockSpec((None, 1, nc), lambda i: (i, 0, 0)),
        scratch_shapes=[
            pltpu.VMEM((16, 96), jnp.float32),   # pooled conv1 activations
            pltpu.VMEM((6, 96), jnp.float32),    # pooled conv2 activations
        ],
        compiler_params=cp,
    )(xp, prep["cb1"], prep["b1e"], prep["cb2"], prep["b2e"],
      prep["wfc1"], prep["bfc1"], prep["wfc2"], prep["bfc2"],
      prep["wfc3"], prep["bfc3"])
    return out.reshape(n, nc)


if __name__ == "__main__":
    key = jax.random.PRNGKey(0)
    pkey, xkey = jax.random.split(key)
    params = init_lenet_params(pkey, num_classes=10)
    prep = prepare_params(params)      # one-time weight re-layout (not per-step)
    # Spatial size must be 32x32 so fc1's 16*6*6 input dimension holds.
    x = jax.random.normal(xkey, (2, 3, 32, 32), jnp.float32)
    out = jax.jit(lenet_forward)(prep, x)
    out = jax.block_until_ready(out)
    assert out.shape == (2, 10) and out.dtype == jnp.float32
    print("KERNEL_OK")
</pallas_src>

<mosaic_0001>
module attributes {stable_mosaic.version = 11 : i64} {
  func.func @_lenet_kernel(%arg0: i32, %arg1: memref<1x36x108xf32, #tpu.memory_space<vmem>>, %arg2: memref<2x5x108x96xbf16, #tpu.memory_space<vmem>>, %arg3: memref<1x96xf32, #tpu.memory_space<vmem>>, %arg4: memref<2x5x96x96xbf16, #tpu.memory_space<vmem>>, %arg5: memref<1x96xf32, #tpu.memory_space<vmem>>, %arg6: memref<576x120xbf16, #tpu.memory_space<vmem>>, %arg7: memref<1x120xf32, #tpu.memory_space<vmem>>, %arg8: memref<120x84xbf16, #tpu.memory_space<vmem>>, %arg9: memref<1x84xf32, #tpu.memory_space<vmem>>, %arg10: memref<84x10xbf16, #tpu.memory_space<vmem>>, %arg11: memref<1x10xf32, #tpu.memory_space<vmem>>, %arg12: memref<1x1x10xf32, #tpu.memory_space<vmem>>, %arg13: memref<16x96xf32, #tpu.memory_space<vmem>>, %arg14: memref<6x96xf32, #tpu.memory_space<vmem>>) attributes {dimension_semantics = [#tpu.dimension_semantics<parallel>], iteration_bounds = array<i64: 2>, scalar_prefetch = 0 : i64, scratch_operands = 2 : i64, tpu.core_type = #tpu.core_type<tc>, window_params = [{transform_indices = @transform_0, window_bounds = array<i64: 1, 36, 108>}, {pipeline_mode = #tpu.pipeline_mode<synchronous>, transform_indices = @transform_1, window_bounds = array<i64: 2, 5, 108, 96>}, {pipeline_mode = #tpu.pipeline_mode<synchronous>, transform_indices = @transform_2, window_bounds = array<i64: 1, 96>}, {pipeline_mode = #tpu.pipeline_mode<synchronous>, transform_indices = @transform_3, window_bounds = array<i64: 2, 5, 96, 96>}, {pipeline_mode = #tpu.pipeline_mode<synchronous>, transform_indices = @transform_4, window_bounds = array<i64: 1, 96>}, {pipeline_mode = #tpu.pipeline_mode<synchronous>, transform_indices = @transform_5, window_bounds = array<i64: 576, 120>}, {pipeline_mode = #tpu.pipeline_mode<synchronous>, transform_indices = @transform_6, window_bounds = array<i64: 1, 120>}, {pipeline_mode = #tpu.pipeline_mode<synchronous>, transform_indices = @transform_7, window_bounds = array<i64: 120, 84>}, {pipeline_mode = #tpu.pipeline_mode<synchronous>, transform_indices = @transform_8, window_bounds = array<i64: 1, 84>}, {pipeline_mode = #tpu.pipeline_mode<synchronous>, transform_indices = @transform_9, window_bounds = array<i64: 84, 10>}, {pipeline_mode = #tpu.pipeline_mode<synchronous>, transform_indices = @transform_10, window_bounds = array<i64: 1, 10>}, {transform_indices = @transform_11, window_bounds = array<i64: 1, 1, 10>}]} {
    %c0 = arith.constant 0 : index
    %c0_0 = arith.constant 0 : index
    %c0_1 = arith.constant 0 : index
    %0 = tpu.strided_load %arg1[%c0, %c0_0, %c0_1] {strides = array<i32: 1, 2, 1>} : memref<1x36x108xf32, #tpu.memory_space<vmem>>, vector<1x16x108xf32>
    %1 = vector.shape_cast %0 : vector<1x16x108xf32> to vector<16x108xf32>
    %2 = arith.truncf %1 : vector<16x108xf32> to vector<16x108xbf16>
    %c0_2 = arith.constant 0 : index
    %c1 = arith.constant 1 : index
    %c0_3 = arith.constant 0 : index
    %3 = tpu.strided_load %arg1[%c0_2, %c1, %c0_3] {strides = array<i32: 1, 2, 1>} : memref<1x36x108xf32, #tpu.memory_space<vmem>>, vector<1x16x108xf32>
    %4 = vector.shape_cast %3 : vector<1x16x108xf32> to vector<16x108xf32>
    %5 = arith.truncf %4 : vector<16x108xf32> to vector<16x108xbf16>
    %c0_4 = arith.constant 0 : index
    %c2 = arith.constant 2 : index
    %c0_5 = arith.constant 0 : index
    %6 = tpu.strided_load %arg1[%c0_4, %c2, %c0_5] {strides = array<i32: 1, 2, 1>} : memref<1x36x108xf32, #tpu.memory_space<vmem>>, vector<1x16x108xf32>
    %7 = vector.shape_cast %6 : vector<1x16x108xf32> to vector<16x108xf32>
    %8 = arith.truncf %7 : vector<16x108xf32> to vector<16x108xbf16>
    %c0_6 = arith.constant 0 : index
    %c3 = arith.constant 3 : index
    %c0_7 = arith.constant 0 : index
    %9 = tpu.strided_load %arg1[%c0_6, %c3, %c0_7] {strides = array<i32: 1, 2, 1>} : memref<1x36x108xf32, #tpu.memory_space<vmem>>, vector<1x16x108xf32>
    %10 = vector.shape_cast %9 : vector<1x16x108xf32> to vector<16x108xf32>
    %11 = arith.truncf %10 : vector<16x108xf32> to vector<16x108xbf16>
    %c0_8 = arith.constant 0 : index
    %c4 = arith.constant 4 : index
    %c0_9 = arith.constant 0 : index
    %12 = tpu.strided_load %arg1[%c0_8, %c4, %c0_9] {strides = array<i32: 1, 2, 1>} : memref<1x36x108xf32, #tpu.memory_space<vmem>>, vector<1x16x108xf32>
    %13 = vector.shape_cast %12 : vector<1x16x108xf32> to vector<16x108xf32>
    %14 = arith.truncf %13 : vector<16x108xf32> to vector<16x108xbf16>
    %c0_10 = arith.constant 0 : index
    %c0_11 = arith.constant 0 : index
    %c0_12 = arith.constant 0 : index
    %c0_13 = arith.constant 0 : index
    %15 = vector.load %arg2[%c0_10, %c0_11, %c0_12, %c0_13] : memref<2x5x108x96xbf16, #tpu.memory_space<vmem>>, vector<1x1x108x96xbf16>
    %16 = vector.shape_cast %15 : vector<1x1x108x96xbf16> to vector<108x96xbf16>
    %cst = arith.constant dense<0.000000e+00> : vector<16x96xf32>
    %17 = tpu.matmul %2, %16, %cst {dimension_numbers = #tpu.dot_dimension_numbers<[1], [0], [0], [1], [0, 0, 1, 1], [], []>} : vector<16x108xbf16>, vector<108x96xbf16>, vector<16x96xf32> -> vector<16x96xf32>
    %c0_14 = arith.constant 0 : index
    %c1_15 = arith.constant 1 : index
    %c0_16 = arith.constant 0 : index
    %c0_17 = arith.constant 0 : index
    %18 = vector.load %arg2[%c0_14, %c1_15, %c0_16, %c0_17] : memref<2x5x108x96xbf16, #tpu.memory_space<vmem>>, vector<1x1x108x96xbf16>
    %19 = vector.shape_cast %18 : vector<1x1x108x96xbf16> to vector<108x96xbf16>
    %cst_18 = arith.constant dense<0.000000e+00> : vector<16x96xf32>
    %20 = tpu.matmul %5, %19, %cst_18 {dimension_numbers = #tpu.dot_dimension_numbers<[1], [0], [0], [1], [0, 0, 1, 1], [], []>} : vector<16x108xbf16>, vector<108x96xbf16>, vector<16x96xf32> -> vector<16x96xf32>
    %21 = arith.addf %17, %20 : vector<16x96xf32>
    %c0_19 = arith.constant 0 : index
    %c2_20 = arith.constant 2 : index
    %c0_21 = arith.constant 0 : index
    %c0_22 = arith.constant 0 : index
    %22 = vector.load %arg2[%c0_19, %c2_20, %c0_21, %c0_22] : memref<2x5x108x96xbf16, #tpu.memory_space<vmem>>, vector<1x1x108x96xbf16>
    %23 = vector.shape_cast %22 : vector<1x1x108x96xbf16> to vector<108x96xbf16>
    %cst_23 = arith.constant dense<0.000000e+00> : vector<16x96xf32>
    %24 = tpu.matmul %8, %23, %cst_23 {dimension_numbers = #tpu.dot_dimension_numbers<[1], [0], [0], [1], [0, 0, 1, 1], [], []>} : vector<16x108xbf16>, vector<108x96xbf16>, vector<16x96xf32> -> vector<16x96xf32>
    %25 = arith.addf %21, %24 : vector<16x96xf32>
    %c0_24 = arith.constant 0 : index
    %c3_25 = arith.constant 3 : index
    %c0_26 = arith.constant 0 : index
    %c0_27 = arith.constant 0 : index
    %26 = vector.load %arg2[%c0_24, %c3_25, %c0_26, %c0_27] : memref<2x5x108x96xbf16, #tpu.memory_space<vmem>>, vector<1x1x108x96xbf16>
    %27 = vector.shape_cast %26 : vector<1x1x108x96xbf16> to vector<108x96xbf16>
    %cst_28 = arith.constant dense<0.000000e+00> : vector<16x96xf32>
    %28 = tpu.matmul %11, %27, %cst_28 {dimension_numbers = #tpu.dot_dimension_numbers<[1], [0], [0], [1], [0, 0, 1, 1], [], []>} : vector<16x108xbf16>, vector<108x96xbf16>, vector<16x96xf32> -> vector<16x96xf32>
    %29 = arith.addf %25, %28 : vector<16x96xf32>
    %c0_29 = arith.constant 0 : index
    %c4_30 = arith.constant 4 : index
    %c0_31 = arith.constant 0 : index
    %c0_32 = arith.constant 0 : index
    %30 = vector.load %arg2[%c0_29, %c4_30, %c0_31, %c0_32] : memref<2x5x108x96xbf16, #tpu.memory_space<vmem>>, vector<1x1x108x96xbf16>
    %31 = vector.shape_cast %30 : vector<1x1x108x96xbf16> to vector<108x96xbf16>
    %cst_33 = arith.constant dense<0.000000e+00> : vector<16x96xf32>
    %32 = tpu.matmul %14, %31, %cst_33 {dimension_numbers = #tpu.dot_dimension_numbers<[1], [0], [0], [1], [0, 0, 1, 1], [], []>} : vector<16x108xbf16>, vector<108x96xbf16>, vector<16x96xf32> -> vector<16x96xf32>
    %33 = arith.addf %29, %32 : vector<16x96xf32>
    %c1_34 = arith.constant 1 : index
    %c0_35 = arith.constant 0 : index
    %c0_36 = arith.constant 0 : index
    %c0_37 = arith.constant 0 : index
    %34 = vector.load %arg2[%c1_34, %c0_35, %c0_36, %c0_37] : memref<2x5x108x96xbf16, #tpu.memory_space<vmem>>, vector<1x1x108x96xbf16>
    %35 = vector.shape_cast %34 : vector<1x1x108x96xbf16> to vector<108x96xbf16>
    %cst_38 = arith.constant dense<0.000000e+00> : vector<16x96xf32>
    %36 = tpu.matmul %2, %35, %cst_38 {dimension_numbers = #tpu.dot_dimension_numbers<[1], [0], [0], [1], [0, 0, 1, 1], [], []>} : vector<16x108xbf16>, vector<108x96xbf16>, vector<16x96xf32> -> vector<16x96xf32>
    %c1_39 = arith.constant 1 : index
    %c1_40 = arith.constant 1 : index
    %c0_41 = arith.constant 0 : index
    %c0_42 = arith.constant 0 : index
    %37 = vector.load %arg2[%c1_39, %c1_40, %c0_41, %c0_42] : memref<2x5x108x96xbf16, #tpu.memory_space<vmem>>, vector<1x1x108x96xbf16>
    %38 = vector.shape_cast %37 : vector<1x1x108x96xbf16> to vector<108x96xbf16>
    %cst_43 = arith.constant dense<0.000000e+00> : vector<16x96xf32>
    %39 = tpu.matmul %5, %38, %cst_43 {dimension_numbers = #tpu.dot_dimension_numbers<[1], [0], [0], [1], [0, 0, 1, 1], [], []>} : vector<16x108xbf16>, vector<108x96xbf16>, vector<16x96xf32> -> vector<16x96xf32>
    %40 = arith.addf %36, %39 : vector<16x96xf32>
    %c1_44 = arith.constant 1 : index
    %c2_45 = arith.constant 2 : index
    %c0_46 = arith.constant 0 : index
    %c0_47 = arith.constant 0 : index
    %41 = vector.load %arg2[%c1_44, %c2_45, %c0_46, %c0_47] : memref<2x5x108x96xbf16, #tpu.memory_space<vmem>>, vector<1x1x108x96xbf16>
    %42 = vector.shape_cast %41 : vector<1x1x108x96xbf16> to vector<108x96xbf16>
    %cst_48 = arith.constant dense<0.000000e+00> : vector<16x96xf32>
    %43 = tpu.matmul %8, %42, %cst_48 {dimension_numbers = #tpu.dot_dimension_numbers<[1], [0], [0], [1], [0, 0, 1, 1], [], []>} : vector<16x108xbf16>, vector<108x96xbf16>, vector<16x96xf32> -> vector<16x96xf32>
    %44 = arith.addf %40, %43 : vector<16x96xf32>
    %c1_49 = arith.constant 1 : index
    %c3_50 = arith.constant 3 : index
    %c0_51 = arith.constant 0 : index
    %c0_52 = arith.constant 0 : index
    %45 = vector.load %arg2[%c1_49, %c3_50, %c0_51, %c0_52] : memref<2x5x108x96xbf16, #tpu.memory_space<vmem>>, vector<1x1x108x96xbf16>
    %46 = vector.shape_cast %45 : vector<1x1x108x96xbf16> to vector<108x96xbf16>
    %cst_53 = arith.constant dense<0.000000e+00> : vector<16x96xf32>
    %47 = tpu.matmul %11, %46, %cst_53 {dimension_numbers = #tpu.dot_dimension_numbers<[1], [0], [0], [1], [0, 0, 1, 1], [], []>} : vector<16x108xbf16>, vector<108x96xbf16>, vector<16x96xf32> -> vector<16x96xf32>
    %48 = arith.addf %44, %47 : vector<16x96xf32>
    %c1_54 = arith.constant 1 : index
    %c4_55 = arith.constant 4 : index
    %c0_56 = arith.constant 0 : index
    %c0_57 = arith.constant 0 : index
    %49 = vector.load %arg2[%c1_54, %c4_55, %c0_56, %c0_57] : memref<2x5x108x96xbf16, #tpu.memory_space<vmem>>, vector<1x1x108x96xbf16>
    %50 = vector.shape_cast %49 : vector<1x1x108x96xbf16> to vector<108x96xbf16>
    %cst_58 = arith.constant dense<0.000000e+00> : vector<16x96xf32>
    %51 = tpu.matmul %14, %50, %cst_58 {dimension_numbers = #tpu.dot_dimension_numbers<[1], [0], [0], [1], [0, 0, 1, 1], [], []>} : vector<16x108xbf16>, vector<108x96xbf16>, vector<16x96xf32> -> vector<16x96xf32>
    %52 = arith.addf %48, %51 : vector<16x96xf32>
    %53 = arith.maximumf %33, %52 : vector<16x96xf32>
    %c0_59 = arith.constant 0 : index
    %c1_60 = arith.constant 1 : index
    %c0_61 = arith.constant 0 : index
    %54 = tpu.strided_load %arg1[%c0_59, %c1_60, %c0_61] {strides = array<i32: 1, 2, 1>} : memref<1x36x108xf32, #tpu.memory_space<vmem>>, vector<1x16x108xf32>
    %55 = vector.shape_cast %54 : vector<1x16x108xf32> to vector<16x108xf32>
    %56 = arith.truncf %55 : vector<16x108xf32> to vector<16x108xbf16>
    %c0_62 = arith.constant 0 : index
    %c2_63 = arith.constant 2 : index
    %c0_64 = arith.constant 0 : index
    %57 = tpu.strided_load %arg1[%c0_62, %c2_63, %c0_64] {strides = array<i32: 1, 2, 1>} : memref<1x36x108xf32, #tpu.memory_space<vmem>>, vector<1x16x108xf32>
    %58 = vector.shape_cast %57 : vector<1x16x108xf32> to vector<16x108xf32>
    %59 = arith.truncf %58 : vector<16x108xf32> to vector<16x108xbf16>
    %c0_65 = arith.constant 0 : index
    %c3_66 = arith.constant 3 : index
    %c0_67 = arith.constant 0 : index
    %60 = tpu.strided_load %arg1[%c0_65, %c3_66, %c0_67] {strides = array<i32: 1, 2, 1>} : memref<1x36x108xf32, #tpu.memory_space<vmem>>, vector<1x16x108xf32>
    %61 = vector.shape_cast %60 : vector<1x16x108xf32> to vector<16x108xf32>
    %62 = arith.truncf %61 : vector<16x108xf32> to vector<16x108xbf16>
    %c0_68 = arith.constant 0 : index
    %c4_69 = arith.constant 4 : index
    %c0_70 = arith.constant 0 : index
    %63 = tpu.strided_load %arg1[%c0_68, %c4_69, %c0_70] {strides = array<i32: 1, 2, 1>} : memref<1x36x108xf32, #tpu.memory_space<vmem>>, vector<1x16x108xf32>
    %64 = vector.shape_cast %63 : vector<1x16x108xf32> to vector<16x108xf32>
    %65 = arith.truncf %64 : vector<16x108xf32> to vector<16x108xbf16>
    %c0_71 = arith.constant 0 : index
    %c5 = arith.constant 5 : index
    %c0_72 = arith.constant 0 : index
    %66 = tpu.strided_load %arg1[%c0_71, %c5, %c0_72] {strides = array<i32: 1, 2, 1>} : memref<1x36x108xf32, #tpu.memory_space<vmem>>, vector<1x16x108xf32>
    %67 = vector.shape_cast %66 : vector<1x16x108xf32> to vector<16x108xf32>
    %68 = arith.truncf %67 : vector<16x108xf32> to vector<16x108xbf16>
    %c0_73 = arith.constant 0 : index
    %c0_74 = arith.constant 0 : index
    %c0_75 = arith.constant 0 : index
    %c0_76 = arith.constant 0 : index
    %69 = vector.load %arg2[%c0_73, %c0_74, %c0_75, %c0_76] : memref<2x5x108x96xbf16, #tpu.memory_space<vmem>>, vector<1x1x108x96xbf16>
    %70 = vector.shape_cast %69 : vector<1x1x108x96xbf16> to vector<108x96xbf16>
    %cst_77 = arith.constant dense<0.000000e+00> : vector<16x96xf32>
    %71 = tpu.matmul %56, %70, %cst_77 {dimension_numbers = #tpu.dot_dimension_numbers<[1], [0], [0], [1], [0, 0, 1, 1], [], []>} : vector<16x108xbf16>, vector<108x96xbf16>, vector<16x96xf32> -> vector<16x96xf32>
    %c0_78 = arith.constant 0 : index
    %c1_79 = arith.constant 1 : index
    %c0_80 = arith.constant 0 : index
    %c0_81 = arith.constant 0 : index
    %72 = vector.load %arg2[%c0_78, %c1_79, %c0_80, %c0_81] : memref<2x5x108x96xbf16, #tpu.memory_space<vmem>>, vector<1x1x108x96xbf16>
    %73 = vector.shape_cast %72 : vector<1x1x108x96xbf16> to vector<108x96xbf16>
    %cst_82 = arith.constant dense<0.000000e+00> : vector<16x96xf32>
    %74 = tpu.matmul %59, %73, %cst_82 {dimension_numbers = #tpu.dot_dimension_numbers<[1], [0], [0], [1], [0, 0, 1, 1], [], []>} : vector<16x108xbf16>, vector<108x96xbf16>, vector<16x96xf32> -> vector<16x96xf32>
    %75 = arith.addf %71, %74 : vector<16x96xf32>
    %c0_83 = arith.constant 0 : index
    %c2_84 = arith.constant 2 : index
    %c0_85 = arith.constant 0 : index
    %c0_86 = arith.constant 0 : index
    %76 = vector.load %arg2[%c0_83, %c2_84, %c0_85, %c0_86] : memref<2x5x108x96xbf16, #tpu.memory_space<vmem>>, vector<1x1x108x96xbf16>
    %77 = vector.shape_cast %76 : vector<1x1x108x96xbf16> to vector<108x96xbf16>
    %cst_87 = arith.constant dense<0.000000e+00> : vector<16x96xf32>
    %78 = tpu.matmul %62, %77, %cst_87 {dimension_numbers = #tpu.dot_dimension_numbers<[1], [0], [0], [1], [0, 0, 1, 1], [], []>} : vector<16x108xbf16>, vector<108x96xbf16>, vector<16x96xf32> -> vector<16x96xf32>
    %79 = arith.addf %75, %78 : vector<16x96xf32>
    %c0_88 = arith.constant 0 : index
    %c3_89 = arith.constant 3 : index
    %c0_90 = arith.constant 0 : index
    %c0_91 = arith.constant 0 : index
    %80 = vector.load %arg2[%c0_88, %c3_89, %c0_90, %c0_91] : memref<2x5x108x96xbf16, #tpu.memory_space<vmem>>, vector<1x1x108x96xbf16>
    %81 = vector.shape_cast %80 : vector<1x1x108x96xbf16> to vector<108x96xbf16>
    %cst_92 = arith.constant dense<0.000000e+00> : vector<16x96xf32>
    %82 = tpu.matmul %65, %81, %cst_92 {dimension_numbers = #tpu.dot_dimension_numbers<[1], [0], [0], [1], [0, 0, 1, 1], [], []>} : vector<16x108xbf16>, vector<108x96xbf16>, vector<16x96xf32> -> vector<16x96xf32>
    %83 = arith.addf %79, %82 : vector<16x96xf32>
    %c0_93 = arith.constant 0 : index
    %c4_94 = arith.constant 4 : index
    %c0_95 = arith.constant 0 : index
    %c0_96 = arith.constant 0 : index
    %84 = vector.load %arg2[%c0_93, %c4_94, %c0_95, %c0_96] : memref<2x5x108x96xbf16, #tpu.memory_space<vmem>>, vector<1x1x108x96xbf16>
    %85 = vector.shape_cast %84 : vector<1x1x108x96xbf16> to vector<108x96xbf16>
    %cst_97 = arith.constant dense<0.000000e+00> : vector<16x96xf32>
    %86 = tpu.matmul %68, %85, %cst_97 {dimension_numbers = #tpu.dot_dimension_numbers<[1], [0], [0], [1], [0, 0, 1, 1], [], []>} : vector<16x108xbf16>, vector<108x96xbf16>, vector<16x96xf32> -> vector<16x96xf32>
    %87 = arith.addf %83, %86 : vector<16x96xf32>
    %88 = arith.maximumf %53, %87 : vector<16x96xf32>
    %c1_98 = arith.constant 1 : index
    %c0_99 = arith.constant 0 : index
    %c0_100 = arith.constant 0 : index
    %c0_101 = arith.constant 0 : index
    %89 = vector.load %arg2[%c1_98, %c0_99, %c0_100, %c0_101] : memref<2x5x108x96xbf16, #tpu.memory_space<vmem>>, vector<1x1x108x96xbf16>
    %90 = vector.shape_cast %89 : vector<1x1x108x96xbf16> to vector<108x96xbf16>
    %cst_102 = arith.constant dense<0.000000e+00> : vector<16x96xf32>
    %91 = tpu.matmul %56, %90, %cst_102 {dimension_numbers = #tpu.dot_dimension_numbers<[1], [0], [0], [1], [0, 0, 1, 1], [], []>} : vector<16x108xbf16>, vector<108x96xbf16>, vector<16x96xf32> -> vector<16x96xf32>
    %c1_103 = arith.constant 1 : index
    %c1_104 = arith.constant 1 : index
    %c0_105 = arith.constant 0 : index
    %c0_106 = arith.constant 0 : index
    %92 = vector.load %arg2[%c1_103, %c1_104, %c0_105, %c0_106] : memref<2x5x108x96xbf16, #tpu.memory_space<vmem>>, vector<1x1x108x96xbf16>
    %93 = vector.shape_cast %92 : vector<1x1x108x96xbf16> to vector<108x96xbf16>
    %cst_107 = arith.constant dense<0.000000e+00> : vector<16x96xf32>
    %94 = tpu.matmul %59, %93, %cst_107 {dimension_numbers = #tpu.dot_dimension_numbers<[1], [0], [0], [1], [0, 0, 1, 1], [], []>} : vector<16x108xbf16>, vector<108x96xbf16>, vector<16x96xf32> -> vector<16x96xf32>
    %95 = arith.addf %91, %94 : vector<16x96xf32>
    %c1_108 = arith.constant 1 : index
    %c2_109 = arith.constant 2 : index
    %c0_110 = arith.constant 0 : index
    %c0_111 = arith.constant 0 : index
    %96 = vector.load %arg2[%c1_108, %c2_109, %c0_110, %c0_111] : memref<2x5x108x96xbf16, #tpu.memory_space<vmem>>, vector<1x1x108x96xbf16>
    %97 = vector.shape_cast %96 : vector<1x1x108x96xbf16> to vector<108x96xbf16>
    %cst_112 = arith.constant dense<0.000000e+00> : vector<16x96xf32>
    %98 = tpu.matmul %62, %97, %cst_112 {dimension_numbers = #tpu.dot_dimension_numbers<[1], [0], [0], [1], [0, 0, 1, 1], [], []>} : vector<16x108xbf16>, vector<108x96xbf16>, vector<16x96xf32> -> vector<16x96xf32>
    %99 = arith.addf %95, %98 : vector<16x96xf32>
    %c1_113 = arith.constant 1 : index
    %c3_114 = arith.constant 3 : index
    %c0_115 = arith.constant 0 : index
    %c0_116 = arith.constant 0 : index
    %100 = vector.load %arg2[%c1_113, %c3_114, %c0_115, %c0_116] : memref<2x5x108x96xbf16, #tpu.memory_space<vmem>>, vector<1x1x108x96xbf16>
    %101 = vector.shape_cast %100 : vector<1x1x108x96xbf16> to vector<108x96xbf16>
    %cst_117 = arith.constant dense<0.000000e+00> : vector<16x96xf32>
    %102 = tpu.matmul %65, %101, %cst_117 {dimension_numbers = #tpu.dot_dimension_numbers<[1], [0], [0], [1], [0, 0, 1, 1], [], []>} : vector<16x108xbf16>, vector<108x96xbf16>, vector<16x96xf32> -> vector<16x96xf32>
    %103 = arith.addf %99, %102 : vector<16x96xf32>
    %c1_118 = arith.constant 1 : index
    %c4_119 = arith.constant 4 : index
    %c0_120 = arith.constant 0 : index
    %c0_121 = arith.constant 0 : index
    %104 = vector.load %arg2[%c1_118, %c4_119, %c0_120, %c0_121] : memref<2x5x108x96xbf16, #tpu.memory_space<vmem>>, vector<1x1x108x96xbf16>
    %105 = vector.shape_cast %104 : vector<1x1x108x96xbf16> to vector<108x96xbf16>
    %cst_122 = arith.constant dense<0.000000e+00> : vector<16x96xf32>
    %106 = tpu.matmul %68, %105, %cst_122 {dimension_numbers = #tpu.dot_dimension_numbers<[1], [0], [0], [1], [0, 0, 1, 1], [], []>} : vector<16x108xbf16>, vector<108x96xbf16>, vector<16x96xf32> -> vector<16x96xf32>
    %107 = arith.addf %103, %106 : vector<16x96xf32>
    %108 = arith.maximumf %88, %107 : vector<16x96xf32>
    %c0_123 = arith.constant 0 : index
    %c0_124 = arith.constant 0 : index
    %109 = vector.load %arg3[%c0_123, %c0_124] : memref<1x96xf32, #tpu.memory_space<vmem>>, vector<1x96xf32>
    %110 = vector.broadcast %109 : vector<1x96xf32> to vector<16x96xf32>
    %111 = arith.addf %108, %110 : vector<16x96xf32>
    %cst_125 = arith.constant 0.000000e+00 : f32
    %112 = vector.broadcast %cst_125 : f32 to vector<16x96xf32>
    %113 = arith.maximumf %111, %112 : vector<16x96xf32>
    %c0_126 = arith.constant 0 : index
    %c0_127 = arith.constant 0 : index
    %114 = vector.load %arg13[%c0_126, %c0_127] : memref<16x96xf32, #tpu.memory_space<vmem>>, vector<16x96xf32>
    tpu.vector_store %arg13[%c0_126, %c0_127], %113 {strides = array<i32>} : memref<16x96xf32, #tpu.memory_space<vmem>>, vector<16x96xf32>,
    %c0_128 = arith.constant 0 : index
    %c0_129 = arith.constant 0 : index
    %115 = tpu.strided_load %arg13[%c0_128, %c0_129] {strides = array<i32: 2, 1>} : memref<16x96xf32, #tpu.memory_space<vmem>>, vector<6x96xf32>
    %116 = arith.truncf %115 : vector<6x96xf32> to vector<6x96xbf16>
    %c1_130 = arith.constant 1 : index
    %c0_131 = arith.constant 0 : index
    %117 = tpu.strided_load %arg13[%c1_130, %c0_131] {strides = array<i32: 2, 1>} : memref<16x96xf32, #tpu.memory_space<vmem>>, vector<6x96xf32>
    %118 = arith.truncf %117 : vector<6x96xf32> to vector<6x96xbf16>
    %c2_132 = arith.constant 2 : index
    %c0_133 = arith.constant 0 : index
    %119 = tpu.strided_load %arg13[%c2_132, %c0_133] {strides = array<i32: 2, 1>} : memref<16x96xf32, #tpu.memory_space<vmem>>, vector<6x96xf32>
    %120 = arith.truncf %119 : vector<6x96xf32> to vector<6x96xbf16>
    %c3_134 = arith.constant 3 : index
    %c0_135 = arith.constant 0 : index
    %121 = tpu.strided_load %arg13[%c3_134, %c0_135] {strides = array<i32: 2, 1>} : memref<16x96xf32, #tpu.memory_space<vmem>>, vector<6x96xf32>
    %122 = arith.truncf %121 : vector<6x96xf32> to vector<6x96xbf16>
    %c4_136 = arith.constant 4 : index
    %c0_137 = arith.constant 0 : index
    %123 = tpu.strided_load %arg13[%c4_136, %c0_137] {strides = array<i32: 2, 1>} : memref<16x96xf32, #tpu.memory_space<vmem>>, vector<6x96xf32>
    %124 = arith.truncf %123 : vector<6x96xf32> to vector<6x96xbf16>
    %c0_138 = arith.constant 0 : index
    %c0_139 = arith.constant 0 : index
    %c0_140 = arith.constant 0 : index
    %c0_141 = arith.constant 0 : index
    %125 = vector.load %arg4[%c0_138, %c0_139, %c0_140, %c0_141] : memref<2x5x96x96xbf16, #tpu.memory_space<vmem>>, vector<1x1x96x96xbf16>
    %126 = vector.shape_cast %125 : vector<1x1x96x96xbf16> to vector<96x96xbf16>
    %cst_142 = arith.constant dense<0.000000e+00> : vector<6x96xf32>
    %127 = tpu.matmul %116, %126, %cst_142 {dimension_numbers = #tpu.dot_dimension_numbers<[1], [0], [0], [1], [0, 0, 1, 1], [], []>} : vector<6x96xbf16>, vector<96x96xbf16>, vector<6x96xf32> -> vector<6x96xf32>
    %c0_143 = arith.constant 0 : index
    %c1_144 = arith.constant 1 : index
    %c0_145 = arith.constant 0 : index
    %c0_146 = arith.constant 0 : index
    %128 = vector.load %arg4[%c0_143, %c1_144, %c0_145, %c0_146] : memref<2x5x96x96xbf16, #tpu.memory_space<vmem>>, vector<1x1x96x96xbf16>
    %129 = vector.shape_cast %128 : vector<1x1x96x96xbf16> to vector<96x96xbf16>
    %cst_147 = arith.constant dense<0.000000e+00> : vector<6x96xf32>
    %130 = tpu.matmul %118, %129, %cst_147 {dimension_numbers = #tpu.dot_dimension_numbers<[1], [0], [0], [1], [0, 0, 1, 1], [], []>} : vector<6x96xbf16>, vector<96x96xbf16>, vector<6x96xf32> -> vector<6x96xf32>
    %131 = arith.addf %127, %130 : vector<6x96xf32>
    %c0_148 = arith.constant 0 : index
    %c2_149 = arith.constant 2 : index
    %c0_150 = arith.constant 0 : index
    %c0_151 = arith.constant 0 : index
    %132 = vector.load %arg4[%c0_148, %c2_149, %c0_150, %c0_151] : memref<2x5x96x96xbf16, #tpu.memory_space<vmem>>, vector<1x1x96x96xbf16>
    %133 = vector.shape_cast %132 : vector<1x1x96x96xbf16> to vector<96x96xbf16>
    %cst_152 = arith.constant dense<0.000000e+00> : vector<6x96xf32>
    %134 = tpu.matmul %120, %133, %cst_152 {dimension_numbers = #tpu.dot_dimension_numbers<[1], [0], [0], [1], [0, 0, 1, 1], [], []>} : vector<6x96xbf16>, vector<96x96xbf16>, vector<6x96xf32> -> vector<6x96xf32>
    %135 = arith.addf %131, %134 : vector<6x96xf32>
    %c0_153 = arith.constant 0 : index
    %c3_154 = arith.constant 3 : index
    %c0_155 = arith.constant 0 : index
    %c0_156 = arith.constant 0 : index
    %136 = vector.load %arg4[%c0_153, %c3_154, %c0_155, %c0_156] : memref<2x5x96x96xbf16, #tpu.memory_space<vmem>>, vector<1x1x96x96xbf16>
    %137 = vector.shape_cast %136 : vector<1x1x96x96xbf16> to vector<96x96xbf16>
    %cst_157 = arith.constant dense<0.000000e+00> : vector<6x96xf32>
    %138 = tpu.matmul %122, %137, %cst_157 {dimension_numbers = #tpu.dot_dimension_numbers<[1], [0], [0], [1], [0, 0, 1, 1], [], []>} : vector<6x96xbf16>, vector<96x96xbf16>, vector<6x96xf32> -> vector<6x96xf32>
    %139 = arith.addf %135, %138 : vector<6x96xf32>
    %c0_158 = arith.constant 0 : index
    %c4_159 = arith.constant 4 : index
    %c0_160 = arith.constant 0 : index
    %c0_161 = arith.constant 0 : index
    %140 = vector.load %arg4[%c0_158, %c4_159, %c0_160, %c0_161] : memref<2x5x96x96xbf16, #tpu.memory_space<vmem>>, vector<1x1x96x96xbf16>
    %141 = vector.shape_cast %140 : vector<1x1x96x96xbf16> to vector<96x96xbf16>
    %cst_162 = arith.constant dense<0.000000e+00> : vector<6x96xf32>
    %142 = tpu.matmul %124, %141, %cst_162 {dimension_numbers = #tpu.dot_dimension_numbers<[1], [0], [0], [1], [0, 0, 1, 1], [], []>} : vector<6x96xbf16>, vector<96x96xbf16>, vector<6x96xf32> -> vector<6x96xf32>
    %143 = arith.addf %139, %142 : vector<6x96xf32>
    %c1_163 = arith.constant 1 : index
    %c0_164 = arith.constant 0 : index
    %c0_165 = arith.constant 0 : index
    %c0_166 = arith.constant 0 : index
    %144 = vector.load %arg4[%c1_163, %c0_164, %c0_165, %c0_166] : memref<2x5x96x96xbf16, #tpu.memory_space<vmem>>, vector<1x1x96x96xbf16>
    %145 = vector.shape_cast %144 : vector<1x1x96x96xbf16> to vector<96x96xbf16>
    %cst_167 = arith.constant dense<0.000000e+00> : vector<6x96xf32>
    %146 = tpu.matmul %116, %145, %cst_167 {dimension_numbers = #tpu.dot_dimension_numbers<[1], [0], [0], [1], [0, 0, 1, 1], [], []>} : vector<6x96xbf16>, vector<96x96xbf16>, vector<6x96xf32> -> vector<6x96xf32>
    %c1_168 = arith.constant 1 : index
    %c1_169 = arith.constant 1 : index
    %c0_170 = arith.constant 0 : index
    %c0_171 = arith.constant 0 : index
    %147 = vector.load %arg4[%c1_168, %c1_169, %c0_170, %c0_171] : memref<2x5x96x96xbf16, #tpu.memory_space<vmem>>, vector<1x1x96x96xbf16>
    %148 = vector.shape_cast %147 : vector<1x1x96x96xbf16> to vector<96x96xbf16>
    %cst_172 = arith.constant dense<0.000000e+00> : vector<6x96xf32>
    %149 = tpu.matmul %118, %148, %cst_172 {dimension_numbers = #tpu.dot_dimension_numbers<[1], [0], [0], [1], [0, 0, 1, 1], [], []>} : vector<6x96xbf16>, vector<96x96xbf16>, vector<6x96xf32> -> vector<6x96xf32>
    %150 = arith.addf %146, %149 : vector<6x96xf32>
    %c1_173 = arith.constant 1 : index
    %c2_174 = arith.constant 2 : index
    %c0_175 = arith.constant 0 : index
    %c0_176 = arith.constant 0 : index
    %151 = vector.load %arg4[%c1_173, %c2_174, %c0_175, %c0_176] : memref<2x5x96x96xbf16, #tpu.memory_space<vmem>>, vector<1x1x96x96xbf16>
    %152 = vector.shape_cast %151 : vector<1x1x96x96xbf16> to vector<96x96xbf16>
    %cst_177 = arith.constant dense<0.000000e+00> : vector<6x96xf32>
    %153 = tpu.matmul %120, %152, %cst_177 {dimension_numbers = #tpu.dot_dimension_numbers<[1], [0], [0], [1], [0, 0, 1, 1], [], []>} : vector<6x96xbf16>, vector<96x96xbf16>, vector<6x96xf32> -> vector<6x96xf32>
    %154 = arith.addf %150, %153 : vector<6x96xf32>
    %c1_178 = arith.constant 1 : index
    %c3_179 = arith.constant 3 : index
    %c0_180 = arith.constant 0 : index
    %c0_181 = arith.constant 0 : index
    %155 = vector.load %arg4[%c1_178, %c3_179, %c0_180, %c0_181] : memref<2x5x96x96xbf16, #tpu.memory_space<vmem>>, vector<1x1x96x96xbf16>
    %156 = vector.shape_cast %155 : vector<1x1x96x96xbf16> to vector<96x96xbf16>
    %cst_182 = arith.constant dense<0.000000e+00> : vector<6x96xf32>
    %157 = tpu.matmul %122, %156, %cst_182 {dimension_numbers = #tpu.dot_dimension_numbers<[1], [0], [0], [1], [0, 0, 1, 1], [], []>} : vector<6x96xbf16>, vector<96x96xbf16>, vector<6x96xf32> -> vector<6x96xf32>
    %158 = arith.addf %154, %157 : vector<6x96xf32>
    %c1_183 = arith.constant 1 : index
    %c4_184 = arith.constant 4 : index
    %c0_185 = arith.constant 0 : index
    %c0_186 = arith.constant 0 : index
    %159 = vector.load %arg4[%c1_183, %c4_184, %c0_185, %c0_186] : memref<2x5x96x96xbf16, #tpu.memory_space<vmem>>, vector<1x1x96x96xbf16>
    %160 = vector.shape_cast %159 : vector<1x1x96x96xbf16> to vector<96x96xbf16>
    %cst_187 = arith.constant dense<0.000000e+00> : vector<6x96xf32>
    %161 = tpu.matmul %124, %160, %cst_187 {dimension_numbers = #tpu.dot_dimension_numbers<[1], [0], [0], [1], [0, 0, 1, 1], [], []>} : vector<6x96xbf16>, vector<96x96xbf16>, vector<6x96xf32> -> vector<6x96xf32>
    %162 = arith.addf %158, %161 : vector<6x96xf32>
    %163 = arith.maximumf %143, %162 : vector<6x96xf32>
    %c1_188 = arith.constant 1 : index
    %c0_189 = arith.constant 0 : index
    %164 = tpu.strided_load %arg13[%c1_188, %c0_189] {strides = array<i32: 2, 1>} : memref<16x96xf32, #tpu.memory_space<vmem>>, vector<6x96xf32>
    %165 = arith.truncf %164 : vector<6x96xf32> to vector<6x96xbf16>
    %c2_190 = arith.constant 2 : index
    %c0_191 = arith.constant 0 : index
    %166 = tpu.strided_load %arg13[%c2_190, %c0_191] {strides = array<i32: 2, 1>} : memref<16x96xf32, #tpu.memory_space<vmem>>, vector<6x96xf32>
    %167 = arith.truncf %166 : vector<6x96xf32> to vector<6x96xbf16>
    %c3_192 = arith.constant 3 : index
    %c0_193 = arith.constant 0 : index
    %168 = tpu.strided_load %arg13[%c3_192, %c0_193] {strides = array<i32: 2, 1>} : memref<16x96xf32, #tpu.memory_space<vmem>>, vector<6x96xf32>
    %169 = arith.truncf %168 : vector<6x96xf32> to vector<6x96xbf16>
    %c4_194 = arith.constant 4 : index
    %c0_195 = arith.constant 0 : index
    %170 = tpu.strided_load %arg13[%c4_194, %c0_195] {strides = array<i32: 2, 1>} : memref<16x96xf32, #tpu.memory_space<vmem>>, vector<6x96xf32>
    %171 = arith.truncf %170 : vector<6x96xf32> to vector<6x96xbf16>
    %c5_196 = arith.constant 5 : index
    %c0_197 = arith.constant 0 : index
    %172 = tpu.strided_load %arg13[%c5_196, %c0_197] {strides = array<i32: 2, 1>} : memref<16x96xf32, #tpu.memory_space<vmem>>, vector<6x96xf32>
    %173 = arith.truncf %172 : vector<6x96xf32> to vector<6x96xbf16>
    %c0_198 = arith.constant 0 : index
    %c0_199 = arith.constant 0 : index
    %c0_200 = arith.constant 0 : index
    %c0_201 = arith.constant 0 : index
    %174 = vector.load %arg4[%c0_198, %c0_199, %c0_200, %c0_201] : memref<2x5x96x96xbf16, #tpu.memory_space<vmem>>, vector<1x1x96x96xbf16>
    %175 = vector.shape_cast %174 : vector<1x1x96x96xbf16> to vector<96x96xbf16>
    %cst_202 = arith.constant dense<0.000000e+00> : vector<6x96xf32>
    %176 = tpu.matmul %165, %175, %cst_202 {dimension_numbers = #tpu.dot_dimension_numbers<[1], [0], [0], [1], [0, 0, 1, 1], [], []>} : vector<6x96xbf16>, vector<96x96xbf16>, vector<6x96xf32> -> vector<6x96xf32>
    %c0_203 = arith.constant 0 : index
    %c1_204 = arith.constant 1 : index
    %c0_205 = arith.constant 0 : index
    %c0_206 = arith.constant 0 : index
    %177 = vector.load %arg4[%c0_203, %c1_204, %c0_205, %c0_206] : memref<2x5x96x96xbf16, #tpu.memory_space<vmem>>, vector<1x1x96x96xbf16>
    %178 = vector.shape_cast %177 : vector<1x1x96x96xbf16> to vector<96x96xbf16>
    %cst_207 = arith.constant dense<0.000000e+00> : vector<6x96xf32>
    %179 = tpu.matmul %167, %178, %cst_207 {dimension_numbers = #tpu.dot_dimension_numbers<[1], [0], [0], [1], [0, 0, 1, 1], [], []>} : vector<6x96xbf16>, vector<96x96xbf16>, vector<6x96xf32> -> vector<6x96xf32>
    %180 = arith.addf %176, %179 : vector<6x96xf32>
    %c0_208 = arith.constant 0 : index
    %c2_209 = arith.constant 2 : index
    %c0_210 = arith.constant 0 : index
    %c0_211 = arith.constant 0 : index
    %181 = vector.load %arg4[%c0_208, %c2_209, %c0_210, %c0_211] : memref<2x5x96x96xbf16, #tpu.memory_space<vmem>>, vector<1x1x96x96xbf16>
    %182 = vector.shape_cast %181 : vector<1x1x96x96xbf16> to vector<96x96xbf16>
    %cst_212 = arith.constant dense<0.000000e+00> : vector<6x96xf32>
    %183 = tpu.matmul %169, %182, %cst_212 {dimension_numbers = #tpu.dot_dimension_numbers<[1], [0], [0], [1], [0, 0, 1, 1], [], []>} : vector<6x96xbf16>, vector<96x96xbf16>, vector<6x96xf32> -> vector<6x96xf32>
    %184 = arith.addf %180, %183 : vector<6x96xf32>
    %c0_213 = arith.constant 0 : index
    %c3_214 = arith.constant 3 : index
    %c0_215 = arith.constant 0 : index
    %c0_216 = arith.constant 0 : index
    %185 = vector.load %arg4[%c0_213, %c3_214, %c0_215, %c0_216] : memref<2x5x96x96xbf16, #tpu.memory_space<vmem>>, vector<1x1x96x96xbf16>
    %186 = vector.shape_cast %185 : vector<1x1x96x96xbf16> to vector<96x96xbf16>
    %cst_217 = arith.constant dense<0.000000e+00> : vector<6x96xf32>
    %187 = tpu.matmul %171, %186, %cst_217 {dimension_numbers = #tpu.dot_dimension_numbers<[1], [0], [0], [1], [0, 0, 1, 1], [], []>} : vector<6x96xbf16>, vector<96x96xbf16>, vector<6x96xf32> -> vector<6x96xf32>
    %188 = arith.addf %184, %187 : vector<6x96xf32>
    %c0_218 = arith.constant 0 : index
    %c4_219 = arith.constant 4 : index
    %c0_220 = arith.constant 0 : index
    %c0_221 = arith.constant 0 : index
    %189 = vector.load %arg4[%c0_218, %c4_219, %c0_220, %c0_221] : memref<2x5x96x96xbf16, #tpu.memory_space<vmem>>, vector<1x1x96x96xbf16>
    %190 = vector.shape_cast %189 : vector<1x1x96x96xbf16> to vector<96x96xbf16>
    %cst_222 = arith.constant dense<0.000000e+00> : vector<6x96xf32>
    %191 = tpu.matmul %173, %190, %cst_222 {dimension_numbers = #tpu.dot_dimension_numbers<[1], [0], [0], [1], [0, 0, 1, 1], [], []>} : vector<6x96xbf16>, vector<96x96xbf16>, vector<6x96xf32> -> vector<6x96xf32>
    %192 = arith.addf %188, %191 : vector<6x96xf32>
    %193 = arith.maximumf %163, %192 : vector<6x96xf32>
    %c1_223 = arith.constant 1 : index
    %c0_224 = arith.constant 0 : index
    %c0_225 = arith.constant 0 : index
    %c0_226 = arith.constant 0 : index
    %194 = vector.load %arg4[%c1_223, %c0_224, %c0_225, %c0_226] : memref<2x5x96x96xbf16, #tpu.memory_space<vmem>>, vector<1x1x96x96xbf16>
    %195 = vector.shape_cast %194 : vector<1x1x96x96xbf16> to vector<96x96xbf16>
    %cst_227 = arith.constant dense<0.000000e+00> : vector<6x96xf32>
    %196 = tpu.matmul %165, %195, %cst_227 {dimension_numbers = #tpu.dot_dimension_numbers<[1], [0], [0], [1], [0, 0, 1, 1], [], []>} : vector<6x96xbf16>, vector<96x96xbf16>, vector<6x96xf32> -> vector<6x96xf32>
    %c1_228 = arith.constant 1 : index
    %c1_229 = arith.constant 1 : index
    %c0_230 = arith.constant 0 : index
    %c0_231 = arith.constant 0 : index
    %197 = vector.load %arg4[%c1_228, %c1_229, %c0_230, %c0_231] : memref<2x5x96x96xbf16, #tpu.memory_space<vmem>>, vector<1x1x96x96xbf16>
    %198 = vector.shape_cast %197 : vector<1x1x96x96xbf16> to vector<96x96xbf16>
    %cst_232 = arith.constant dense<0.000000e+00> : vector<6x96xf32>
    %199 = tpu.matmul %167, %198, %cst_232 {dimension_numbers = #tpu.dot_dimension_numbers<[1], [0], [0], [1], [0, 0, 1, 1], [], []>} : vector<6x96xbf16>, vector<96x96xbf16>, vector<6x96xf32> -> vector<6x96xf32>
    %200 = arith.addf %196, %199 : vector<6x96xf32>
    %c1_233 = arith.constant 1 : index
    %c2_234 = arith.constant 2 : index
    %c0_235 = arith.constant 0 : index
    %c0_236 = arith.constant 0 : index
    %201 = vector.load %arg4[%c1_233, %c2_234, %c0_235, %c0_236] : memref<2x5x96x96xbf16, #tpu.memory_space<vmem>>, vector<1x1x96x96xbf16>
    %202 = vector.shape_cast %201 : vector<1x1x96x96xbf16> to vector<96x96xbf16>
    %cst_237 = arith.constant dense<0.000000e+00> : vector<6x96xf32>
    %203 = tpu.matmul %169, %202, %cst_237 {dimension_numbers = #tpu.dot_dimension_numbers<[1], [0], [0], [1], [0, 0, 1, 1], [], []>} : vector<6x96xbf16>, vector<96x96xbf16>, vector<6x96xf32> -> vector<6x96xf32>
    %204 = arith.addf %200, %203 : vector<6x96xf32>
    %c1_238 = arith.constant 1 : index
    %c3_239 = arith.constant 3 : index
    %c0_240 = arith.constant 0 : index
    %c0_241 = arith.constant 0 : index
    %205 = vector.load %arg4[%c1_238, %c3_239, %c0_240, %c0_241] : memref<2x5x96x96xbf16, #tpu.memory_space<vmem>>, vector<1x1x96x96xbf16>
    %206 = vector.shape_cast %205 : vector<1x1x96x96xbf16> to vector<96x96xbf16>
    %cst_242 = arith.constant dense<0.000000e+00> : vector<6x96xf32>
    %207 = tpu.matmul %171, %206, %cst_242 {dimension_numbers = #tpu.dot_dimension_numbers<[1], [0], [0], [1], [0, 0, 1, 1], [], []>} : vector<6x96xbf16>, vector<96x96xbf16>, vector<6x96xf32> -> vector<6x96xf32>
    %208 = arith.addf %204, %207 : vector<6x96xf32>
    %c1_243 = arith.constant 1 : index
    %c4_244 = arith.constant 4 : index
    %c0_245 = arith.constant 0 : index
    %c0_246 = arith.constant 0 : index
    %209 = vector.load %arg4[%c1_243, %c4_244, %c0_245, %c0_246] : memref<2x5x96x96xbf16, #tpu.memory_space<vmem>>, vector<1x1x96x96xbf16>
    %210 = vector.shape_cast %209 : vector<1x1x96x96xbf16> to vector<96x96xbf16>
    %cst_247 = arith.constant dense<0.000000e+00> : vector<6x96xf32>
    %211 = tpu.matmul %173, %210, %cst_247 {dimension_numbers = #tpu.dot_dimension_numbers<[1], [0], [0], [1], [0, 0, 1, 1], [], []>} : vector<6x96xbf16>, vector<96x96xbf16>, vector<6x96xf32> -> vector<6x96xf32>
    %212 = arith.addf %208, %211 : vector<6x96xf32>
    %213 = arith.maximumf %193, %212 : vector<6x96xf32>
    %c0_248 = arith.constant 0 : index
    %c0_249 = arith.constant 0 : index
    %214 = vector.load %arg5[%c0_248, %c0_249] : memref<1x96xf32, #tpu.memory_space<vmem>>, vector<1x96xf32>
    %215 = vector.broadcast %214 : vector<1x96xf32> to vector<6x96xf32>
    %216 = arith.addf %213, %215 : vector<6x96xf32>
    %cst_250 = arith.constant 0.000000e+00 : f32
    %217 = vector.broadcast %cst_250 : f32 to vector<6x96xf32>
    %218 = arith.maximumf %216, %217 : vector<6x96xf32>
    %c0_251 = arith.constant 0 : index
    %c0_252 = arith.constant 0 : index
    %219 = vector.load %arg14[%c0_251, %c0_252] : memref<6x96xf32, #tpu.memory_space<vmem>>, vector<6x96xf32>
    tpu.vector_store %arg14[%c0_251, %c0_252], %218 {strides = array<i32>} : memref<6x96xf32, #tpu.memory_space<vmem>>, vector<6x96xf32>,
    %c0_253 = arith.constant 0 : index
    %c0_254 = arith.constant 0 : index
    %220 = vector.load %arg14[%c0_253, %c0_254] : memref<6x96xf32, #tpu.memory_space<vmem>>, vector<1x96xf32>
    %221 = arith.truncf %220 : vector<1x96xf32> to vector<1x96xbf16>
    %c0_255 = arith.constant 0 : index
    %c0_256 = arith.constant 0 : index
    %222 = vector.load %arg6[%c0_255, %c0_256] : memref<576x120xbf16, #tpu.memory_space<vmem>>, vector<96x120xbf16>
    %cst_257 = arith.constant dense<0.000000e+00> : vector<1x120xf32>
    %223 = tpu.matmul %221, %222, %cst_257 {dimension_numbers = #tpu.dot_dimension_numbers<[1], [0], [0], [1], [0, 0, 1, 1], [], []>} : vector<1x96xbf16>, vector<96x120xbf16>, vector<1x120xf32> -> vector<1x120xf32>
    %c1_258 = arith.constant 1 : index
    %c0_259 = arith.constant 0 : index
    %224 = vector.load %arg14[%c1_258, %c0_259] : memref<6x96xf32, #tpu.memory_space<vmem>>, vector<1x96xf32>
    %225 = arith.truncf %224 : vector<1x96xf32> to vector<1x96xbf16>
    %c96 = arith.constant 96 : index
    %c0_260 = arith.constant 0 : index
    %226 = vector.load %arg6[%c96, %c0_260] : memref<576x120xbf16, #tpu.memory_space<vmem>>, vector<96x120xbf16>
    %cst_261 = arith.constant dense<0.000000e+00> : vector<1x120xf32>
    %227 = tpu.matmul %225, %226, %cst_261 {dimension_numbers = #tpu.dot_dimension_numbers<[1], [0], [0], [1], [0, 0, 1, 1], [], []>} : vector<1x96xbf16>, vector<96x120xbf16>, vector<1x120xf32> -> vector<1x120xf32>
    %228 = arith.addf %223, %227 : vector<1x120xf32>
    %c2_262 = arith.constant 2 : index
    %c0_263 = arith.constant 0 : index
    %229 = vector.load %arg14[%c2_262, %c0_263] : memref<6x96xf32, #tpu.memory_space<vmem>>, vector<1x96xf32>
    %230 = arith.truncf %229 : vector<1x96xf32> to vector<1x96xbf16>
    %c192 = arith.constant 192 : index
    %c0_264 = arith.constant 0 : index
    %231 = vector.load %arg6[%c192, %c0_264] : memref<576x120xbf16, #tpu.memory_space<vmem>>, vector<96x120xbf16>
    %cst_265 = arith.constant dense<0.000000e+00> : vector<1x120xf32>
    %232 = tpu.matmul %230, %231, %cst_265 {dimension_numbers = #tpu.dot_dimension_numbers<[1], [0], [0], [1], [0, 0, 1, 1], [], []>} : vector<1x96xbf16>, vector<96x120xbf16>, vector<1x120xf32> -> vector<1x120xf32>
    %233 = arith.addf %228, %232 : vector<1x120xf32>
    %c3_266 = arith.constant 3 : index
    %c0_267 = arith.constant 0 : index
    %234 = vector.load %arg14[%c3_266, %c0_267] : memref<6x96xf32, #tpu.memory_space<vmem>>, vector<1x96xf32>
    %235 = arith.truncf %234 : vector<1x96xf32> to vector<1x96xbf16>
    %c288 = arith.constant 288 : index
    %c0_268 = arith.constant 0 : index
    %236 = vector.load %arg6[%c288, %c0_268] : memref<576x120xbf16, #tpu.memory_space<vmem>>, vector<96x120xbf16>
    %cst_269 = arith.constant dense<0.000000e+00> : vector<1x120xf32>
    %237 = tpu.matmul %235, %236, %cst_269 {dimension_numbers = #tpu.dot_dimension_numbers<[1], [0], [0], [1], [0, 0, 1, 1], [], []>} : vector<1x96xbf16>, vector<96x120xbf16>, vector<1x120xf32> -> vector<1x120xf32>
    %238 = arith.addf %233, %237 : vector<1x120xf32>
    %c4_270 = arith.constant 4 : index
    %c0_271 = arith.constant 0 : index
    %239 = vector.load %arg14[%c4_270, %c0_271] : memref<6x96xf32, #tpu.memory_space<vmem>>, vector<1x96xf32>
    %240 = arith.truncf %239 : vector<1x96xf32> to vector<1x96xbf16>
    %c384 = arith.constant 384 : index
    %c0_272 = arith.constant 0 : index
    %241 = vector.load %arg6[%c384, %c0_272] : memref<576x120xbf16, #tpu.memory_space<vmem>>, vector<96x120xbf16>
    %cst_273 = arith.constant dense<0.000000e+00> : vector<1x120xf32>
    %242 = tpu.matmul %240, %241, %cst_273 {dimension_numbers = #tpu.dot_dimension_numbers<[1], [0], [0], [1], [0, 0, 1, 1], [], []>} : vector<1x96xbf16>, vector<96x120xbf16>, vector<1x120xf32> -> vector<1x120xf32>
    %243 = arith.addf %238, %242 : vector<1x120xf32>
    %c5_274 = arith.constant 5 : index
    %c0_275 = arith.constant 0 : index
    %244 = vector.load %arg14[%c5_274, %c0_275] : memref<6x96xf32, #tpu.memory_space<vmem>>, vector<1x96xf32>
    %245 = arith.truncf %244 : vector<1x96xf32> to vector<1x96xbf16>
    %c480 = arith.constant 480 : index
    %c0_276 = arith.constant 0 : index
    %246 = vector.load %arg6[%c480, %c0_276] : memref<576x120xbf16, #tpu.memory_space<vmem>>, vector<96x120xbf16>
    %cst_277 = arith.constant dense<0.000000e+00> : vector<1x120xf32>
    %247 = tpu.matmul %245, %246, %cst_277 {dimension_numbers = #tpu.dot_dimension_numbers<[1], [0], [0], [1], [0, 0, 1, 1], [], []>} : vector<1x96xbf16>, vector<96x120xbf16>, vector<1x120xf32> -> vector<1x120xf32>
    %248 = arith.addf %243, %247 : vector<1x120xf32>
    %c0_278 = arith.constant 0 : index
    %c0_279 = arith.constant 0 : index
    %249 = vector.load %arg7[%c0_278, %c0_279] : memref<1x120xf32, #tpu.memory_space<vmem>>, vector<1x120xf32>
    %250 = arith.addf %248, %249 : vector<1x120xf32>
    %cst_280 = arith.constant 0.000000e+00 : f32
    %251 = vector.broadcast %cst_280 : f32 to vector<1x120xf32>
    %252 = arith.maximumf %250, %251 : vector<1x120xf32>
    %253 = arith.truncf %252 : vector<1x120xf32> to vector<1x120xbf16>
    %c0_281 = arith.constant 0 : index
    %c0_282 = arith.constant 0 : index
    %254 = vector.load %arg8[%c0_281, %c0_282] : memref<120x84xbf16, #tpu.memory_space<vmem>>, vector<120x84xbf16>
    %cst_283 = arith.constant dense<0.000000e+00> : vector<1x84xf32>
    %255 = tpu.matmul %253, %254, %cst_283 {dimension_numbers = #tpu.dot_dimension_numbers<[1], [0], [0], [1], [0, 0, 1, 1], [], []>} : vector<1x120xbf16>, vector<120x84xbf16>, vector<1x84xf32> -> vector<1x84xf32>
    %c0_284 = arith.constant 0 : index
    %c0_285 = arith.constant 0 : index
    %256 = vector.load %arg9[%c0_284, %c0_285] : memref<1x84xf32, #tpu.memory_space<vmem>>, vector<1x84xf32>
    %257 = arith.addf %255, %256 : vector<1x84xf32>
    %cst_286 = arith.constant 0.000000e+00 : f32
    %258 = vector.broadcast %cst_286 : f32 to vector<1x84xf32>
    %259 = arith.maximumf %257, %258 : vector<1x84xf32>
    %260 = arith.truncf %259 : vector<1x84xf32> to vector<1x84xbf16>
    %c0_287 = arith.constant 0 : index
    %c0_288 = arith.constant 0 : index
    %261 = vector.load %arg10[%c0_287, %c0_288] : memref<84x10xbf16, #tpu.memory_space<vmem>>, vector<84x10xbf16>
    %cst_289 = arith.constant dense<0.000000e+00> : vector<1x10xf32>
    %262 = tpu.matmul %260, %261, %cst_289 {dimension_numbers = #tpu.dot_dimension_numbers<[1], [0], [0], [1], [0, 0, 1, 1], [], []>} : vector<1x84xbf16>, vector<84x10xbf16>, vector<1x10xf32> -> vector<1x10xf32>
    %c0_290 = arith.constant 0 : index
    %c0_291 = arith.constant 0 : index
    %263 = vector.load %arg11[%c0_290, %c0_291] : memref<1x10xf32, #tpu.memory_space<vmem>>, vector<1x10xf32>
    %264 = arith.addf %262, %263 : vector<1x10xf32>
    %c0_292 = arith.constant 0 : index
    %c0_293 = arith.constant 0 : index
    %c0_294 = arith.constant 0 : index
    %265 = vector.load %arg12[%c0_292, %c0_293, %c0_294] : memref<1x1x10xf32, #tpu.memory_space<vmem>>, vector<1x1x10xf32>
    %266 = vector.shape_cast %265 : vector<1x1x10xf32> to vector<1x10xf32>
    %267 = vector.shape_cast %264 : vector<1x10xf32> to vector<1x1x10xf32>
    tpu.vector_store %arg12[%c0_292, %c0_293, %c0_294], %267 {strides = array<i32>} : memref<1x1x10xf32, #tpu.memory_space<vmem>>, vector<1x1x10xf32>,
    return
  }
  func.func @transform_0(%arg0: i32) -> (i32, i32, i32) {
    %c0_i32 = arith.constant 0 : i32
    %c0_i32_0 = arith.constant 0 : i32
    %c0_i32_1 = arith.constant 0 : i32
    return %arg0, %c0_i32, %c0_i32_0 : i32, i32, i32
  }
  func.func @transform_1(%arg0: i32) -> (i32, i32, i32, i32) {
    %c0_i32 = arith.constant 0 : i32
    %c0_i32_0 = arith.constant 0 : i32
    %c0_i32_1 = arith.constant 0 : i32
    %c0_i32_2 = arith.constant 0 : i32
    %c0_i32_3 = arith.constant 0 : i32
    return %c0_i32, %c0_i32_0, %c0_i32_1, %c0_i32_2 : i32, i32, i32, i32
  }
  func.func @transform_2(%arg0: i32) -> (i32, i32) {
    %c0_i32 = arith.constant 0 : i32
    %c0_i32_0 = arith.constant 0 : i32
    %c0_i32_1 = arith.constant 0 : i32
    return %c0_i32, %c0_i32_0 : i32, i32
  }
  func.func @transform_3(%arg0: i32) -> (i32, i32, i32, i32) {
    %c0_i32 = arith.constant 0 : i32
    %c0_i32_0 = arith.constant 0 : i32
    %c0_i32_1 = arith.constant 0 : i32
    %c0_i32_2 = arith.constant 0 : i32
    %c0_i32_3 = arith.constant 0 : i32
    return %c0_i32, %c0_i32_0, %c0_i32_1, %c0_i32_2 : i32, i32, i32, i32
  }
  func.func @transform_4(%arg0: i32) -> (i32, i32) {
    %c0_i32 = arith.constant 0 : i32
    %c0_i32_0 = arith.constant 0 : i32
    %c0_i32_1 = arith.constant 0 : i32
    return %c0_i32, %c0_i32_0 : i32, i32
  }
  func.func @transform_5(%arg0: i32) -> (i32, i32) {
    %c0_i32 = arith.constant 0 : i32
    %c0_i32_0 = arith.constant 0 : i32
    %c0_i32_1 = arith.constant 0 : i32
    return %c0_i32, %c0_i32_0 : i32, i32
  }
  func.func @transform_6(%arg0: i32) -> (i32, i32) {
    %c0_i32 = arith.constant 0 : i32
    %c0_i32_0 = arith.constant 0 : i32
    %c0_i32_1 = arith.constant 0 : i32
    return %c0_i32, %c0_i32_0 : i32, i32
  }
  func.func @transform_7(%arg0: i32) -> (i32, i32) {
    %c0_i32 = arith.constant 0 : i32
    %c0_i32_0 = arith.constant 0 : i32
    %c0_i32_1 = arith.constant 0 : i32
    return %c0_i32, %c0_i32_0 : i32, i32
  }
  func.func @transform_8(%arg0: i32) -> (i32, i32) {
    %c0_i32 = arith.constant 0 : i32
    %c0_i32_0 = arith.constant 0 : i32
    %c0_i32_1 = arith.constant 0 : i32
    return %c0_i32, %c0_i32_0 : i32, i32
  }
  func.func @transform_9(%arg0: i32) -> (i32, i32) {
    %c0_i32 = arith.constant 0 : i32
    %c0_i32_0 = arith.constant 0 : i32
    %c0_i32_1 = arith.constant 0 : i32
    return %c0_i32, %c0_i32_0 : i32, i32
  }
  func.func @transform_10(%arg0: i32) -> (i32, i32) {
    %c0_i32 = arith.constant 0 : i32
    %c0_i32_0 = arith.constant 0 : i32
    %c0_i32_1 = arith.constant 0 : i32
    return %c0_i32, %c0_i32_0 : i32, i32
  }
  func.func @transform_11(%arg0: i32) -> (i32, i32, i32) {
    %c0_i32 = arith.constant 0 : i32
    %c0_i32_0 = arith.constant 0 : i32
    %c0_i32_1 = arith.constant 0 : i32
    return %arg0, %c0_i32, %c0_i32_0 : i32, i32, i32
  }
}

</mosaic_0001>

<bundles_post_ra>
// kernel: lenet_forward.1
= control target key start
LH: loop header
LB: loop body
LE: loop exit
PB: predicated region body
PF: predicated region fallthrough
CT: control target
= control target key end

     0   :  { %s7908_s0 = inlined_call_operand.vmem [shape: f32[2,36,108], index: 0, kind: input, shape index: {}]   ;;  %s7909_s1 = inlined_call_operand.vmem [shape: bf16[2,5,108,96], index: 1, kind: input, shape index: {}]   ;;  %s7910_s2 = inlined_call_operand.vmem [shape: f32[1,96], index: 2, kind: input, shape index: {}]   ;;  %s7911_s3 = inlined_call_operand.vmem [shape: bf16[2,5,96,96], index: 3, kind: input, shape index: {}]   ;;  %s7912_s4 = inlined_call_operand.vmem [shape: f32[1,96], index: 4, kind: input, shape index: {}]   ;;  %s7913_s5 = inlined_call_operand.vmem [shape: bf16[576,120], index: 5, kind: input, shape index: {}]   ;;  %s7914_s6 = inlined_call_operand.vmem [shape: f32[1,120], index: 6, kind: input, shape index: {}]   ;;  %s7915_s7 = inlined_call_operand.vmem [shape: bf16[120,84], index: 7, kind: input, shape index: {}]   ;;  %s7916_s8 = inlined_call_operand.vmem [shape: f32[1,84], index: 8, kind: input, shape index: {}]   ;;  %s7917_s9 = inlined_call_operand.vmem [shape: bf16[84,10], index: 9, kind: input, shape index: {}]   ;;  %s7918_s10 = inlined_call_operand.vmem [shape: f32[1,10], index: 10, kind: input, shape index: {}]   ;;  %s7919_s11 = inlined_call_operand.hbm [shape: f32[2,1,10], index: 11, kind: output, shape index: {}]  }
   0x1   :  { %7922 = sst [smem:[#allocation9_spill]] %s7908_s0 }
   0x2   :  { %16 = vsyncpa [#allocation5], 0 }
   0x3   :  { %18 = vsyncpa [#allocation5 + $0x1], 0  ;;  %s6227_s17 = smov 0   ;;  %s6229_s18 = smov 0  }
   0x4   :  { %s6231_s19 = smov 0   ;;  %s6233_s20 = smov 0  }
   0x5 LB: > { %s6248_s21 = sadd.s32 4294967295, %s6162_s20   ;;  %s4077_s22 = sadd.s32 4294967294, %s6162_s20   ;;  %s6162_s20 = sphi %s6233_s20, %s7933_s20   ;;  %s6158_s19 = sphi %s6231_s19, %s7932_s19   ;;  %s6154_s18 = sphi %s6229_s18, %s7931_s18   ;;  %s6150_s17 = sphi %s6227_s17, %s7930_s17  }
   0x6   : > { %s6252_s23 = sadd.s32 1, %s6162_s20   ;;  %s267_s24 = sadd.s32 1, %s6158_s19 }
   0x7   : > { %s264_s25 = ssub.s32 %s6162_s20, %s6252_s23  ;;  %p277_p0 = scmp.ne.s32.totalorder %s6158_s19, %s6154_s18 }
   0x8   : > { %p265_p1 = scmp.eq.s32.totalorder %s264_s25, 0  ;;  %p278_p2 = scmp.eq.s32.totalorder %s6248_s21, 1 }
   0x9   : > { %p283_p3 = scmp.ne.s32.totalorder %s6154_s18, %s6150_s17  ;;  %p284_p4 = scmp.eq.s32.totalorder %s4077_s22, 1 }
   0xa   : > { %s6263_s26 = scalar_select %p265_p1, %s6158_s19, %s267_s24  }
   0xb   : > { %p6265_p5 = por %p278_p2, %p277_p0  ;;  %p6269_p6 = por %p284_p4, %p283_p3 }
   0xc   : > { %p4080_p7 = scmp.ge.s32.totalorder %s6162_s20, 1  ;;  %p340_p8 = scmp.lt.s32.totalorder %s6162_s20, 3 }
   0xe   : > { %p341_p9 = pnand %p4080_p7, %p340_p8 }
  0x10   : > { %344 = sbr.rel (%p341_p9) target bundleno = 1698 (0x6a2), region = 64 }
  0x17   : > { %v5900_v0 = vld [vmem:[%s7909_s1 + $0x38] sm:$0xff]   ;;  %v6164_v1 = vmov 0.0   ;;  %v5901_v2 = vld [vmem:[%s7909_s1 + $0x150] sm:$0xff]   ;;  %v5902_v3 = vld [vmem:[%s7909_s1 + $0x40] sm:$0xff]   ;;  %vm6165_vm0 = vmmov 0   ;;  %p379_p10 = scmp.lt.s32.totalorder %s6248_s21, 1 }
  0x18   : > { %4918 = vmatprep.subr.bf16.mxu0 %v6164_v1  ;;  %5008 = vmatprep.subr.bf16.mxu1 %v6164_v1  ;;  %v5903_v4 = vld [vmem:[%s7909_s1 + $0x158] sm:$0xff]   ;;  %v5904_v5 = vld [vmem:[%s7909_s1 + $0x48] sm:$0xff]   ;;  %v5905_v6 = vld [vmem:[%s7909_s1 + $0x160] sm:$0xff]   ;;  %vm483_vm1 = vcmask 1045504   ;;  %s7925_s0 = sld [smem:[#allocation9_spill]]  ;;  %vm479_vm2 = vcmask 883712  }
  0x19   : > { %4919 = vmatpush3.bf16.msra.mxu0 %v5900_v0  ;;  %5009 = vmatpush3.bf16.msra.mxu1 %v5901_v2  ;;  %v5906_v7 = vld [vmem:[%s7909_s1 + $0x50] sm:$0xff]   ;;  %s380_s14 = scalar_select %p379_p10, %s6248_s21, 1  ;;  %v5907_v8 = vld [vmem:[%s7909_s1 + $0x168] sm:$0xff]   ;;  %v5908_v9 = vld [vmem:[%s7909_s1 + $0x58] sm:$0xff]   ;;  %vm1884_vm3 = vcmask 785408   ;;  %vm3235_vm4 = vcmask 783360  }
  0x1a   : > { %4920 = vmatprep.subr.bf16.mxu0 %v6164_v1  ;;  %5010 = vmatprep.subr.bf16.mxu1 %v6164_v1  ;;  %v5909_v10 = vld [vmem:[%s7909_s1 + $0x170] sm:$0xff]   ;;  %v5910_v11 = vld [vmem:[%s7909_s1 + $0x60] sm:$0xff]   ;;  %v5911_v12 = vld [vmem:[%s7909_s1 + $0x178] sm:$0xff]   ;;  %vm3868_vm5 = vcmask 1043456   ;;  %vm3864_vm6 = vcmask 982016   ;;  %vm3963_vm7 = vcmask 1041408  }
  0x1b   : > { %4932 = vmatprep.mubr.msk.bf16.mxu0 %vm6165_vm0, %v6164_v1  ;;  %5022 = vmatprep.mubr.msk.bf16.mxu1 %vm6165_vm0, %v6164_v1  ;;  %s5858_s25 = smul.u32 40, %s380_s14  ;;  %v5912_v13 = vld [vmem:[%s7909_s1 + $0x68] sm:$0x3f]   ;;  %v5913_v14 = vld [vmem:[%s7909_s1 + $0x180] sm:$0x3f]   ;;  %v5915_v21 = vld [vmem:[%s7909_s1 + $0x118] sm:$0xff]  }
  0x1c   : > { %v6344_v17 = vsel %vm483_vm1, %v5912_v13, 0  ;;  %v6348_v18 = vsel %vm483_vm1, %v5913_v14, 0  ;;  %v5914_v20 = vld [vmem:[%s7909_s1] sm:$0xff]   ;;  %v5916_v22 = vld [vmem:[%s7909_s1 + $0x8] sm:$0xff]   ;;  %v5918_v24 = vld [vmem:[%s7909_s1 + $0x10] sm:$0xff]   ;;  %vm3959_vm8 = vcmask 687104  }
  0x1d   : > { %4921 = vmatpush3.bf16.msra.mxu0 %v5902_v3  ;;  %5011 = vmatpush3.bf16.msra.mxu1 %v5903_v4  ;;  %v5917_v23 = vld [vmem:[%s7909_s1 + $0x120] sm:$0xff]   ;;  %v5919_v25 = vld [vmem:[%s7909_s1 + $0x128] sm:$0xff]   ;;  %v5920_v26 = vld [vmem:[%s7909_s1 + $0x18] sm:$0xff]   ;;  %s377_s14 = sand.u32 1, %s6154_s18   ;;  %s4557_s30 = sshll.u32 %s6248_s21, 4  ;;  %vm4007_vm9 = vcmask 73728  }
  0x1e   : > { %4922 = vmatprep.subr.bf16.mxu0 %v6164_v1  ;;  %5012 = vmatprep.subr.bf16.mxu1 %v6164_v1  ;;  %s6330_s24 = scalar_lea.vmem %s7925_s0, %s5858_s25  ;;  %v5921_v27 = vld [vmem:[%s7909_s1 + $0x130] sm:$0xff]   ;;  %v6397_v28 = vld [vmem:[%s7909_s1 + $0x20] sm:$0xff]   ;;  %v6403_v29 = vld [vmem:[%s7909_s1 + $0x138] sm:$0xff]   ;;  %s378_s12 = scalar_lea.vmem [#allocation4], %s377_s14 }
  0x1f   : > { %v4083_v15 = vld [vmem:[%s6330_s24 + $0x1] ss:$2 sm:$0xff]  ;;  %v4084_v16 = vld [vmem:[%s6330_s24 + $0x11] ss:$2 sm:$0xff]  ;;  %v385_v34 = vld [vmem:[%s6330_s24] ss:$2 sm:$0xff]  ;;  %s7866_s15 = scalar_lea.hbm %s7919_s11, %s4557_s30 }
  0x20   : > { %v6350_v19 = vpack.c.bf16 %v4084_v16, %v4083_v15  ;;  %v6409_v30 = vld [vmem:[%s7909_s1 + $0x28] sm:$0xff]   ;;  %v6415_v31 = vld [vmem:[%s7909_s1 + $0x140] sm:$0xff]   ;;  %v5926_v32 = vld [vmem:[%s7909_s1 + $0x30] sm:$0x3f]   ;;  %s4022_s13 = sshll.u32 %s378_s12, 4  ;;  %s4010_s21 = scalar_lea.sflag [#allocation5], %s377_s14  ;;  %s7868_s13 = int_to_ptr.vmem [resolvable:$true] %s4022_s13 }
  0x21   : > { %4923 = vmatpush3.bf16.msra.mxu0 %v5904_v5  ;;  %5013 = vmatpush3.bf16.msra.mxu1 %v5905_v6  ;;  %v5927_v33 = vld [vmem:[%s7909_s1 + $0x148] sm:$0x3f]   ;;  %v4082_v35 = vld [vmem:[%s6330_s24 + $0x10] ss:$2 sm:$0xff]  ;;  %v6432_v36 = vsel %vm483_vm1, %v5926_v32, 0  ;;  %v6476_v43 = vld [vmem:[%s7909_s1 + $0x80] sm:$0xff]  }
  0x22   : > { %4924 = vmatprep.subr.bf16.mxu0 %v6164_v1  ;;  %5014 = vmatprep.subr.bf16.mxu1 %v6164_v1  ;;  %v6436_v37 = vsel %vm483_vm1, %v5927_v33, 0  ;;  %v388_v38 = vpack.c.bf16 %v4082_v35, %v385_v34  ;;  %v6442_v39 = vld [vmem:[%s7909_s1 + $0x70] sm:$0xff]   ;;  %v6449_v40 = vld [vmem:[%s7909_s1 + $0x188] sm:$0xff]   ;;  %v6458_v41 = vld [vmem:[%s7909_s1 + $0x78] sm:$0xff]   ;;  %s6100_s16 = scalar_lea.vmem %s7868_s13, 16  ;;  %s6166_s0 = smov [#allocation4]  }
  0x23   : > { %v6465_v42 = vld [vmem:[%s7909_s1 + $0x190] sm:$0xff]   ;;  %v6483_v44 = vld [vmem:[%s7909_s1 + $0x198] sm:$0xff]   ;;  %v6489_v45 = vld [vmem:[%s7909_s1 + $0x88] sm:$0xff]   ;;  %p6101_p11 = scmp.ne.s32.totalorder %s7868_s13, %s6100_s16  ;;  %s6104_s22 = sshll.u32 %s6166_s0, 4  ;;  %s6105_s22 = int_to_ptr.vmem [resolvable:$false] %s6104_s22 }
  0x24   : > { %v6495_v46 = vld [vmem:[%s7909_s1 + $0x1a0] sm:$0xff]   ;;  %v5941_v48 = vld [vmem:[%s7909_s1 + $0x1b8] sm:$0x3f]   ;;  %v6509_v49 = vld [vmem:[%s7909_s1 + $0x90] sm:$0xff]   ;;  %s6106_s29 = scalar_lea.vmem %s6105_s22, 32  ;;  %p6107_p0 = scmp.lt.s32.totalorder %s7868_s13, %s6105_s22 }
  0x25   : > { %4925 = vmatpush3.bf16.msra.mxu0 %v5906_v7  ;;  %5015 = vmatpush3.bf16.msra.mxu1 %v5907_v8  ;;  %v5940_v47 = vld [vmem:[%s7909_s1 + $0xa0] sm:$0x3f]   ;;  %v5954_v50 = vld [vmem:[%s7909_s1 + $0xd8] sm:$0x3f]   ;;  %v5955_v51 = vld [vmem:[%s7909_s1 + $0x1f0] sm:$0x3f]   ;;  %p6102_p12 = pnand %p6101_p11, %p6265_p5  ;;  %p6108_p1 = scmp.lt.s32.totalorder %s6106_s29, %s6100_s16 }
  0x26   : > { %4926 = vmatprep.subr.bf16.mxu0 %v6164_v1  ;;  %5016 = vmatprep.subr.bf16.mxu1 %v6164_v1  ;;  %v6521_v52 = vld [vmem:[%s7909_s1 + $0x1a8] sm:$0xff]   ;;  %v5968_v53 = vld [vmem:[%s7909_s1 + $0x110] sm:$0x3f]   ;;  %v6532_v54 = vld [vmem:[%s7909_s1 + $0x98] sm:$0xff]   ;;  %v6543_v57 = vsel %vm483_vm1, %v5940_v47, 0  ;;  %v6546_v58 = vsel %vm483_vm1, %v5941_v48, 0 }
  0x27   : > { %v5969_v55 = vld [vmem:[%s7909_s1 + $0x228] sm:$0x3f]   ;;  %v6540_v56 = vld [vmem:[%s7909_s1 + $0x1b0] sm:$0xff]   ;;  %v6549_v59 = vsel %vm483_vm1, %v5954_v50, 0  ;;  %v6552_v60 = vsel %vm483_vm1, %v5955_v51, 0  ;;  %v6556_v61 = vsel %vm483_vm1, %v5968_v53, 0  ;;  %p6103_p13 = pneg %p6102_p12  ;;  %p6109_p2 = por %p6108_p1, %p6107_p0 }
  0x28   : > { %v6559_v62 = vsel %vm483_vm1, %v5969_v55, 0  ;;  %v4085_v63 = vld [vmem:[%s6330_s24 + $0x2] ss:$2 sm:$0xff]  ;;  %v4086_v0 = vld [vmem:[%s6330_s24 + $0x12] ss:$2 sm:$0xff] }
  0x29   : > { %4927 = vmatpush3.bf16.msra.mxu0 %v5908_v9  ;;  %5017 = vmatpush3.bf16.msra.mxu1 %v5909_v10  ;;  %v6573_v2 = vld [vmem:[%s7909_s1 + $0xa8] sm:$0xff]   ;;  %v6575_v3 = vpack.c.bf16 %v4086_v0, %v4085_v63  ;;  %v6580_v4 = vld [vmem:[%s7909_s1 + $0x1c0] sm:$0xff]   ;;  %v6589_v5 = vld [vmem:[%s7909_s1 + $0xb0] sm:$0xff]   ;;  %p6110_p3 = pnand %p6109_p2, %p6103_p13 }
  0x2a   : > { %4928 = vmatprep.subr.bf16.mxu0 %v6164_v1  ;;  %5018 = vmatprep.subr.bf16.mxu1 %v6164_v1  ;;  %v6596_v6 = vld [vmem:[%s7909_s1 + $0x1c8] sm:$0xff]   ;;  %v6607_v7 = vld [vmem:[%s7909_s1 + $0xb8] sm:$0xff]   ;;  %v6614_v8 = vld [vmem:[%s7909_s1 + $0x1d0] sm:$0xff]  }
  0x2b   : > { %v6625_v9 = vld [vmem:[%s7909_s1 + $0xc0] sm:$0xff]   ;;  %v6630_v10 = vld [vmem:[%s7909_s1 + $0x1d8] sm:$0xff]   ;;  %v6653_v13 = vld [vmem:[%s7909_s1 + $0xd0] sm:$0xff]  }
  0x2c   : > { %v6658_v14 = vld [vmem:[%s7909_s1 + $0x1e8] sm:$0xff]   ;;  %v4088_v16 = vld [vmem:[%s6330_s24 + $0x13] ss:$2 sm:$0xff]  ;;  %v4090_v48 = vld [vmem:[%s6330_s24 + $0x14] ss:$2 sm:$0xff] }
  0x2d   : > { %4929 = vmatpush3.bf16.msra.mxu0 %v5910_v11  ;;  %5019 = vmatpush3.bf16.msra.mxu1 %v5911_v12  ;;  %v6639_v11 = vld [vmem:[%s7909_s1 + $0xc8] sm:$0xff]   ;;  %v6644_v12 = vld [vmem:[%s7909_s1 + $0x1e0] sm:$0xff]   ;;  %v6730_v32 = vld [vmem:[%s7909_s1 + $0x210] sm:$0xff]  }
  0x2e   : > { %4930 = vmatprep.subr.bf16.mxu0 %v6164_v1  ;;  %5020 = vmatprep.subr.bf16.mxu1 %v6164_v1  ;;  %v4087_v15 = vld [vmem:[%s6330_s24 + $0x3] ss:$2 sm:$0xff]  ;;  %v6744_v34 = vld [vmem:[%s7909_s1 + $0x218] sm:$0xff]   ;;  %v4089_v47 = vld [vmem:[%s6330_s24 + $0x4] ss:$2 sm:$0xff] }
  0x2f   : > { %v6739_v33 = vld [vmem:[%s7909_s1 + $0x100] sm:$0xff]   ;;  %v6753_v35 = vld [vmem:[%s7909_s1 + $0x108] sm:$0xff]   ;;  %v6770_v50 = vpack.c.bf16 %v4090_v48, %v4089_v47  ;;  %v6080_v51 = vld [vmem:[%s7909_s1 + $0x38] sm:$0xff]  }
  0x30   : > { %v6081_v53 = vld [vmem:[%s7909_s1 + $0x150] sm:$0xff]   ;;  %v6082_v55 = vld [vmem:[%s7909_s1 + $0x40] sm:$0xff]   ;;  %v6083_v63 = vld [vmem:[%s7909_s1 + $0x158] sm:$0xff]  }
  0x31   : > { %4931 = vmatpush3.bf16.msra.mxu0 %v6344_v17  ;;  %5021 = vmatpush3.bf16.msra.mxu1 %v6348_v18  ;;  %v6084_v0 = vld [vmem:[%s7909_s1 + $0x48] sm:$0xff]   ;;  %v6088_v48 = vld [vmem:[%s7909_s1 + $0x58] sm:$0xff]  }
  0x32   : > { %4936 = vmatprep.subr.bf16.mxu0 %v6164_v1  ;;  %5026 = vmatprep.subr.bf16.mxu1 %v6164_v1  ;;  %v6087_v47 = vld [vmem:[%s7909_s1 + $0x168] sm:$0xff]  }
  0x34   : > { %4933 = vmatmul.mubr.msk.bf16.vlgmr.msra.gmra.mrb[0].mxu0 %vm479_vm2, %v6350_v19  ;;  %5023 = vmatmul.mubr.msk.bf16.vlgmr.msra.gmra.mrb[0].mxu1 %vm479_vm2, %v6350_v19 }
  0x35   : > { %4937 = vmatpush3.bf16.msra.mxu0 %v5914_v20  ;;  %5027 = vmatpush3.bf16.msra.mxu1 %v5915_v21  ;;  %v6673_v20 = vld [vmem:[%s7909_s1 + $0xe0] sm:$0xff]   ;;  %v6675_v21 = vpack.c.bf16 %v4088_v16, %v4087_v15  ;;  %v6086_v16 = vld [vmem:[%s7909_s1 + $0x50] sm:$0xff]  }
  0x36   : > { %4938 = vmatprep.subr.bf16.mxu0 %v6164_v1  ;;  %5028 = vmatprep.subr.bf16.mxu1 %v6164_v1  ;;  %v6085_v15 = vld [vmem:[%s7909_s1 + $0x160] sm:$0xff]  }
  0x37   : > { %4950 = vmatprep.mubr.msk.bf16.mxu0 %vm6165_vm0, %v6164_v1  ;;  %5040 = vmatprep.mubr.msk.bf16.mxu1 %vm6165_vm0, %v6164_v1 }
  0x39   : > { %4939 = vmatpush3.bf16.msra.mxu0 %v5916_v22  ;;  %5029 = vmatpush3.bf16.msra.mxu1 %v5917_v23  ;;  %v6680_v22 = vld [vmem:[%s7909_s1 + $0x1f8] sm:$0xff]   ;;  %v6689_v23 = vld [vmem:[%s7909_s1 + $0xe8] sm:$0xff]  }
  0x3a   : > { %4940 = vmatprep.subr.bf16.mxu0 %v6164_v1  ;;  %5030 = vmatprep.subr.bf16.mxu1 %v6164_v1 }
  0x3d   : > { %4941 = vmatpush3.bf16.msra.mxu0 %v5918_v24  ;;  %5031 = vmatpush3.bf16.msra.mxu1 %v5919_v25  ;;  %v6696_v24 = vld [vmem:[%s7909_s1 + $0x200] sm:$0xff]   ;;  %v6707_v25 = vld [vmem:[%s7909_s1 + $0xf0] sm:$0xff]  }
  0x3e   : > { %4942 = vmatprep.subr.bf16.mxu0 %v6164_v1  ;;  %5032 = vmatprep.subr.bf16.mxu1 %v6164_v1 }
  0x41   : > { %4943 = vmatpush3.bf16.msra.mxu0 %v5920_v26  ;;  %5033 = vmatpush3.bf16.msra.mxu1 %v5921_v27  ;;  %v6714_v26 = vld [vmem:[%s7909_s1 + $0x208] sm:$0xff]   ;;  %v6725_v27 = vld [vmem:[%s7909_s1 + $0xf8] sm:$0xff]  }
  0x42   : > { %4944 = vmatprep.subr.bf16.mxu0 %v6164_v1  ;;  %5034 = vmatprep.subr.bf16.mxu1 %v6164_v1 }
  0x45   : > { %4945 = vmatpush3.bf16.msra.mxu0 %v6397_v28  ;;  %5035 = vmatpush3.bf16.msra.mxu1 %v6403_v29 }
  0x46   : > { %4946 = vmatprep.subr.bf16.mxu0 %v6164_v1  ;;  %5036 = vmatprep.subr.bf16.mxu1 %v6164_v1 }
  0x49   : > { %4947 = vmatpush3.bf16.msra.mxu0 %v6409_v30  ;;  %5037 = vmatpush3.bf16.msra.mxu1 %v6415_v31 }
  0x4a   : > { %4948 = vmatprep.subr.bf16.mxu0 %v6164_v1  ;;  %5038 = vmatprep.subr.bf16.mxu1 %v6164_v1 }
  0x4d   : > { %4949 = vmatpush3.bf16.msra.mxu0 %v6432_v36  ;;  %5039 = vmatpush3.bf16.msra.mxu1 %v6436_v37 }
  0x4e   : > { %4954 = vmatprep.subr.bf16.mxu0 %v6164_v1  ;;  %5044 = vmatprep.subr.bf16.mxu1 %v6164_v1 }
  0x50   : > { %4951 = vmatmul.mubr.msk.bf16.vlgmr.msra.gmra.mrb[0].mxu0 %vm479_vm2, %v388_v38  ;;  %5041 = vmatmul.mubr.msk.bf16.vlgmr.msra.gmra.mrb[0].mxu1 %vm479_vm2, %v388_v38  ;;  %v6758_v38 = vld [vmem:[%s7909_s1 + $0x220] sm:$0xff]  }
  0x51   : > { %4955 = vmatpush3.bf16.msra.mxu0 %v6442_v39  ;;  %5045 = vmatpush3.bf16.msra.mxu1 %v6449_v40 }
  0x52   : > { %4956 = vmatprep.subr.bf16.mxu0 %v6164_v1  ;;  %5046 = vmatprep.subr.bf16.mxu1 %v6164_v1 }
  0x53   : > { %4968 = vmatprep.mubr.msk.bf16.mxu0 %vm6165_vm0, %v6164_v1  ;;  %5058 = vmatprep.mubr.msk.bf16.mxu1 %vm6165_vm0, %v6164_v1 }
  0x55   : > { %4957 = vmatpush3.bf16.msra.mxu0 %v6458_v41  ;;  %5047 = vmatpush3.bf16.msra.mxu1 %v6465_v42 }
  0x56   : > { %4958 = vmatprep.subr.bf16.mxu0 %v6164_v1  ;;  %5048 = vmatprep.subr.bf16.mxu1 %v6164_v1 }
  0x59   : > { %4959 = vmatpush3.bf16.msra.mxu0 %v6476_v43  ;;  %5049 = vmatpush3.bf16.msra.mxu1 %v6483_v44 }
  0x5a   : > { %4960 = vmatprep.subr.bf16.mxu0 %v6164_v1  ;;  %5050 = vmatprep.subr.bf16.mxu1 %v6164_v1 }
  0x5d   : > { %4961 = vmatpush3.bf16.msra.mxu0 %v6489_v45  ;;  %5051 = vmatpush3.bf16.msra.mxu1 %v6495_v46 }
  0x5e   : > { %4962 = vmatprep.subr.bf16.mxu0 %v6164_v1  ;;  %5052 = vmatprep.subr.bf16.mxu1 %v6164_v1 }
  0x61   : > { %4963 = vmatpush3.bf16.msra.mxu0 %v6509_v49  ;;  %5053 = vmatpush3.bf16.msra.mxu1 %v6521_v52 }
  0x62   : > { %4964 = vmatprep.subr.bf16.mxu0 %v6164_v1  ;;  %5054 = vmatprep.subr.bf16.mxu1 %v6164_v1 }
  0x65   : > { %4965 = vmatpush3.bf16.msra.mxu0 %v6532_v54  ;;  %5055 = vmatpush3.bf16.msra.mxu1 %v6540_v56 }
  0x66   : > { %4966 = vmatprep.subr.bf16.mxu0 %v6164_v1  ;;  %5056 = vmatprep.subr.bf16.mxu1 %v6164_v1 }
  0x69   : > { %4967 = vmatpush3.bf16.msra.mxu0 %v6543_v57  ;;  %5057 = vmatpush3.bf16.msra.mxu1 %v6546_v58 }
  0x6a   : > { %4972 = vmatprep.subr.bf16.mxu0 %v6164_v1  ;;  %5062 = vmatprep.subr.bf16.mxu1 %v6164_v1 }
  0x6c   : > { %4969 = vmatmul.mubr.msk.bf16.vlgmr.msra.gmra.mrb[0].mxu0 %vm479_vm2, %v6575_v3  ;;  %5059 = vmatmul.mubr.msk.bf16.vlgmr.msra.gmra.mrb[0].mxu1 %vm479_vm2, %v6575_v3 }
  0x6d   : > { %4973 = vmatpush3.bf16.msra.mxu0 %v6573_v2  ;;  %5063 = vmatpush3.bf16.msra.mxu1 %v6580_v4 }
  0x6e   : > { %4974 = vmatprep.subr.bf16.mxu0 %v6164_v1  ;;  %5064 = vmatprep.subr.bf16.mxu1 %v6164_v1 }
  0x6f   : > { %4986 = vmatprep.mubr.msk.bf16.mxu0 %vm6165_vm0, %v6164_v1  ;;  %5076 = vmatprep.mubr.msk.bf16.mxu1 %vm6165_vm0, %v6164_v1 }
  0x71   : > { %4975 = vmatpush3.bf16.msra.mxu0 %v6589_v5  ;;  %5065 = vmatpush3.bf16.msra.mxu1 %v6596_v6 }
  0x72   : > { %4976 = vmatprep.subr.bf16.mxu0 %v6164_v1  ;;  %5066 = vmatprep.subr.bf16.mxu1 %v6164_v1 }
  0x75   : > { %4977 = vmatpush3.bf16.msra.mxu0 %v6607_v7  ;;  %5067 = vmatpush3.bf16.msra.mxu1 %v6614_v8 }
  0x76   : > { %4978 = vmatprep.subr.bf16.mxu0 %v6164_v1  ;;  %5068 = vmatprep.subr.bf16.mxu1 %v6164_v1 }
  0x79   : > { %4979 = vmatpush3.bf16.msra.mxu0 %v6625_v9  ;;  %5069 = vmatpush3.bf16.msra.mxu1 %v6630_v10 }
  0x7a   : > { %4980 = vmatprep.subr.bf16.mxu0 %v6164_v1  ;;  %5070 = vmatprep.subr.bf16.mxu1 %v6164_v1 }
  0x7d   : > { %4981 = vmatpush3.bf16.msra.mxu0 %v6639_v11  ;;  %5071 = vmatpush3.bf16.msra.mxu1 %v6644_v12 }
  0x7e   : > { %4982 = vmatprep.subr.bf16.mxu0 %v6164_v1  ;;  %5072 = vmatprep.subr.bf16.mxu1 %v6164_v1 }
  0x81   : > { %4983 = vmatpush3.bf16.msra.mxu0 %v6653_v13  ;;  %5073 = vmatpush3.bf16.msra.mxu1 %v6658_v14 }
  0x82   : > { %4984 = vmatprep.subr.bf16.mxu0 %v6164_v1  ;;  %5074 = vmatprep.subr.bf16.mxu1 %v6164_v1 }
  0x85   : > { %4985 = vmatpush3.bf16.msra.mxu0 %v6549_v59  ;;  %5075 = vmatpush3.bf16.msra.mxu1 %v6552_v60 }
  0x86   : > { %4990 = vmatprep.subr.bf16.mxu0 %v6164_v1  ;;  %5080 = vmatprep.subr.bf16.mxu1 %v6164_v1 }
  0x88   : > { %4987 = vmatmul.mubr.msk.bf16.vlgmr.msra.gmra.mrb[0].mxu0 %vm479_vm2, %v6675_v21  ;;  %5077 = vmatmul.mubr.msk.bf16.vlgmr.msra.gmra.mrb[0].mxu1 %vm479_vm2, %v6675_v21 }
  0x89   : > { %4991 = vmatpush3.bf16.msra.mxu0 %v6673_v20  ;;  %5081 = vmatpush3.bf16.msra.mxu1 %v6680_v22 }
  0x8a   : > { %4992 = vmatprep.subr.bf16.mxu0 %v6164_v1  ;;  %5082 = vmatprep.subr.bf16.mxu1 %v6164_v1 }
  0x8b   : > { %5004 = vmatprep.mubr.msk.bf16.mxu0 %vm6165_vm0, %v6164_v1  ;;  %5094 = vmatprep.mubr.msk.bf16.mxu1 %vm6165_vm0, %v6164_v1 }
  0x8d   : > { %4993 = vmatpush3.bf16.msra.mxu0 %v6689_v23  ;;  %5083 = vmatpush3.bf16.msra.mxu1 %v6696_v24 }
  0x8e   : > { %4994 = vmatprep.subr.bf16.mxu0 %v6164_v1  ;;  %5084 = vmatprep.subr.bf16.mxu1 %v6164_v1 }
  0x91   : > { %4995 = vmatpush3.bf16.msra.mxu0 %v6707_v25  ;;  %5085 = vmatpush3.bf16.msra.mxu1 %v6714_v26 }
  0x92   : > { %4996 = vmatprep.subr.bf16.mxu0 %v6164_v1  ;;  %5086 = vmatprep.subr.bf16.mxu1 %v6164_v1 }
  0x95   : > { %4997 = vmatpush3.bf16.msra.mxu0 %v6725_v27  ;;  %5087 = vmatpush3.bf16.msra.mxu1 %v6730_v32 }
  0x96   : > { %4998 = vmatprep.subr.bf16.mxu0 %v6164_v1  ;;  %5088 = vmatprep.subr.bf16.mxu1 %v6164_v1 }
  0x99   : > { %4999 = vmatpush3.bf16.msra.mxu0 %v6739_v33  ;;  %5089 = vmatpush3.bf16.msra.mxu1 %v6744_v34 }
  0x9a   : > { %5000 = vmatprep.subr.bf16.mxu0 %v6164_v1  ;;  %5090 = vmatprep.subr.bf16.mxu1 %v6164_v1 }
  0x9d   : > { %5001 = vmatpush3.bf16.msra.mxu0 %v6753_v35  ;;  %5091 = vmatpush3.bf16.msra.mxu1 %v6758_v38 }
  0x9e   : > { %5002 = vmatprep.subr.bf16.mxu0 %v6164_v1  ;;  %5092 = vmatprep.subr.bf16.mxu1 %v6164_v1 }
  0xa1   : > { %5003 = vmatpush3.bf16.msra.mxu0 %v6556_v61  ;;  %5093 = vmatpush3.bf16.msra.mxu1 %v6559_v62 }
  0xa2   : > { %5098 = vmatprep.subr.bf16.mxu0 %v6164_v1  ;;  %5188 = vmatprep.subr.bf16.mxu1 %v6164_v1 }
  0xa4   : > { %5005 = vmatmul.mubr.msk.bf16.vlgmr.msra.gmra.mrb[0].mxu0 %vm479_vm2, %v6770_v50  ;;  %5095 = vmatmul.mubr.msk.bf16.vlgmr.msra.gmra.mrb[0].mxu1 %vm479_vm2, %v6770_v50 }
  0xa5   : > { %5099 = vmatpush3.bf16.msra.mxu0 %v6080_v51  ;;  %5189 = vmatpush3.bf16.msra.mxu1 %v6081_v53  ;;  %v6089_v51 = vld [vmem:[%s7909_s1 + $0x170] sm:$0xff]   ;;  %v6090_v53 = vld [vmem:[%s7909_s1 + $0x60] sm:$0xff]  }
  0xa6   : > { %5100 = vmatprep.subr.bf16.mxu0 %v6164_v1  ;;  %5190 = vmatprep.subr.bf16.mxu1 %v6164_v1 }
  0xa7   : > { %5112 = vmatprep.mubr.msk.bf16.mxu0 %vm6165_vm0, %v6164_v1  ;;  %5202 = vmatprep.mubr.msk.bf16.mxu1 %vm6165_vm0, %v6164_v1 }
  0xa9   : > { %5101 = vmatpush3.bf16.msra.mxu0 %v6082_v55  ;;  %5191 = vmatpush3.bf16.msra.mxu1 %v6083_v63  ;;  %v6091_v55 = vld [vmem:[%s7909_s1 + $0x178] sm:$0xff]   ;;  %v6092_v63 = vld [vmem:[%s7909_s1] sm:$0xff]  }
  0xaa   : > { %5102 = vmatprep.subr.bf16.mxu0 %v6164_v1  ;;  %5192 = vmatprep.subr.bf16.mxu1 %v6164_v1 }
  0xad   : > { %5103 = vmatpush3.bf16.msra.mxu0 %v6084_v0  ;;  %5193 = vmatpush3.bf16.msra.mxu1 %v6085_v15  ;;  %v6096_v0 = vld [vmem:[%s7909_s1 + $0x10] sm:$0xff]   ;;  %v6097_v15 = vld [vmem:[%s7909_s1 + $0x128] sm:$0xff]  }
  0xae   : > { %5104 = vmatprep.subr.bf16.mxu0 %v6164_v1  ;;  %5194 = vmatprep.subr.bf16.mxu1 %v6164_v1 }
  0xb1   : > { %5105 = vmatpush3.bf16.msra.mxu0 %v6086_v16  ;;  %5195 = vmatpush3.bf16.msra.mxu1 %v6087_v47  ;;  %v6098_v16 = vld [vmem:[%s7909_s1 + $0x18] sm:$0xff]   ;;  %v6099_v47 = vld [vmem:[%s7909_s1 + $0x130] sm:$0xff]  }
  0xb2   : > { %5106 = vmatprep.subr.bf16.mxu0 %v6164_v1  ;;  %5196 = vmatprep.subr.bf16.mxu1 %v6164_v1 }
  0xb5   : > { %5107 = vmatpush3.bf16.msra.mxu0 %v6088_v48  ;;  %5197 = vmatpush3.bf16.msra.mxu1 %v6089_v51  ;;  %v7151_v48 = vld [vmem:[%s7911_s3 + $0x108] sm:$0xff]   ;;  %v7160_v51 = vld [vmem:[%s7911_s3 + $0x20] sm:$0xff]  }
  0xb6   : > { %5108 = vmatprep.subr.bf16.mxu0 %v6164_v1  ;;  %5198 = vmatprep.subr.bf16.mxu1 %v6164_v1 }
  0xb9   : > { %5109 = vmatpush3.bf16.msra.mxu0 %v6090_v53  ;;  %5199 = vmatpush3.bf16.msra.mxu1 %v6091_v55  ;;  %v7165_v53 = vld [vmem:[%s7911_s3 + $0x110] sm:$0xff]   ;;  %v7174_v55 = vld [vmem:[%s7911_s3 + $0x28] sm:$0xff]  }
  0xba   : > { %5110 = vmatprep.subr.bf16.mxu0 %v6164_v1  ;;  %5200 = vmatprep.subr.bf16.mxu1 %v6164_v1 }
  0xbd   : > { %5111 = vmatpush3.bf16.msra.mxu0 %v6344_v17  ;;  %5201 = vmatpush3.bf16.msra.mxu1 %v6348_v18  ;;  %v6093_v17 = vld [vmem:[%s7909_s1 + $0x118] sm:$0xff]   ;;  %v6094_v18 = vld [vmem:[%s7909_s1 + $0x8] sm:$0xff]  }
  0xbe   : > { %5116 = vmatprep.subr.bf16.mxu0 %v6164_v1  ;;  %5206 = vmatprep.subr.bf16.mxu1 %v6164_v1 }
  0xc0   : > { %5113 = vmatmul.mubr.msk.bf16.vlgmr.msra.gmra.mrb[4].mxu0 %vm479_vm2, %v6575_v3  ;;  %5203 = vmatmul.mubr.msk.bf16.vlgmr.msra.gmra.mrb[4].mxu1 %vm479_vm2, %v6575_v3  ;;  %v6095_v3 = vld [vmem:[%s7909_s1 + $0x120] sm:$0xff]  }
  0xc1   : > { %5117 = vmatpush3.bf16.msra.mxu0 %v6092_v63  ;;  %5207 = vmatpush3.bf16.msra.mxu1 %v6093_v17  ;;  %v7179_v63 = vld [vmem:[%s7911_s3 + $0x118] sm:$0xff]  }
  0xc2   : > { %5118 = vmatprep.subr.bf16.mxu0 %v6164_v1  ;;  %5208 = vmatprep.subr.bf16.mxu1 %v6164_v1 }
  0xc3   : > { %5130 = vmatprep.mubr.msk.bf16.mxu0 %vm6165_vm0, %v6164_v1  ;;  %5220 = vmatprep.mubr.msk.bf16.mxu1 %vm6165_vm0, %v6164_v1 }
  0xc5   : > { %5119 = vmatpush3.bf16.msra.mxu0 %v6094_v18  ;;  %5209 = vmatpush3.bf16.msra.mxu1 %v6095_v3  ;;  %v7188_v18 = vld [vmem:[%s7911_s3 + $0x60] sm:$0xff]   ;;  %v7193_v3 = vld [vmem:[%s7911_s3 + $0x150] sm:$0xff]  }
  0xc6   : > { %5120 = vmatprep.subr.bf16.mxu0 %v6164_v1  ;;  %5210 = vmatprep.subr.bf16.mxu1 %v6164_v1 }
  0xc9   : > { %5121 = vmatpush3.bf16.msra.mxu0 %v6096_v0  ;;  %5211 = vmatpush3.bf16.msra.mxu1 %v6097_v15  ;;  %v7204_v15 = vld [vmem:[%s7911_s3 + $0x68] sm:$0xff]  }
  0xca   : > { %5122 = vmatprep.subr.bf16.mxu0 %v6164_v1  ;;  %5212 = vmatprep.subr.bf16.mxu1 %v6164_v1 }
  0xcd   : > { %5123 = vmatpush3.bf16.msra.mxu0 %v6098_v16  ;;  %5213 = vmatpush3.bf16.msra.mxu1 %v6099_v47  ;;  %v7209_v16 = vld [vmem:[%s7911_s3 + $0x158] sm:$0xff]   ;;  %v7222_v47 = vld [vmem:[%s7911_s3 + $0x70] sm:$0xff]  }
  0xce   : > { %5124 = vmatprep.subr.bf16.mxu0 %v6164_v1  ;;  %5214 = vmatprep.subr.bf16.mxu1 %v6164_v1 }
  0xd1   : > { %5125 = vmatpush3.bf16.msra.mxu0 %v6397_v28  ;;  %5215 = vmatpush3.bf16.msra.mxu1 %v6403_v29  ;;  %v4298_v28 = vld [vmem:[%s6330_s24 + $0x15] ss:$2 sm:$0xff] }
  0xd2   : > { %5126 = vmatprep.subr.bf16.mxu0 %v6164_v1  ;;  %5216 = vmatprep.subr.bf16.mxu1 %v6164_v1 }
  0xd5   : > { %5127 = vmatpush3.bf16.msra.mxu0 %v6409_v30  ;;  %5217 = vmatpush3.bf16.msra.mxu1 %v6415_v31  ;;  %v6998_v30 = vld [vmem:[%s7911_s3 + $0x30] sm:$0xff]   ;;  %v7005_v31 = vld [vmem:[%s7911_s3 + $0x120] sm:$0xff]  }
  0xd6   : > { %5128 = vmatprep.subr.bf16.mxu0 %v6164_v1  ;;  %5218 = vmatprep.subr.bf16.mxu1 %v6164_v1 }
  0xd9   : > { %5129 = vmatpush3.bf16.msra.mxu0 %v6432_v36  ;;  %5219 = vmatpush3.bf16.msra.mxu1 %v6436_v37 }
  0xda   : > { %5134 = vmatprep.subr.bf16.mxu0 %v6164_v1  ;;  %5224 = vmatprep.subr.bf16.mxu1 %v6164_v1 }
  0xdc   : > { %5131 = vmatmul.mubr.msk.bf16.vlgmr.msra.gmra.mrb[4].mxu0 %vm479_vm2, %v6350_v19  ;;  %5221 = vmatmul.mubr.msk.bf16.vlgmr.msra.gmra.mrb[4].mxu1 %vm479_vm2, %v6350_v19  ;;  %v4297_v19 = vld [vmem:[%s6330_s24 + $0x5] ss:$2 sm:$0xff] }
  0xdd   : > { %5135 = vmatpush3.bf16.msra.mxu0 %v6442_v39  ;;  %5225 = vmatpush3.bf16.msra.mxu1 %v6449_v40  ;;  %v1443_v29 = vpack.c.bf16 %v4298_v28, %v4297_v19  ;;  %v7227_v19 = vld [vmem:[%s7911_s3 + $0x160] sm:$0xff]   ;;  %v7236_v28 = vld [vmem:[%s7911_s3 + $0x78] sm:$0xff]  }
  0xde   : > { %5136 = vmatprep.subr.bf16.mxu0 %v6164_v1  ;;  %5226 = vmatprep.subr.bf16.mxu1 %v6164_v1 }
  0xdf   : > { %5148 = vmatprep.mubr.msk.bf16.mxu0 %vm6165_vm0, %v6164_v1  ;;  %5238 = vmatprep.mubr.msk.bf16.mxu1 %vm6165_vm0, %v6164_v1 }
  0xe1   : > { %5137 = vmatpush3.bf16.msra.mxu0 %v6458_v41  ;;  %5227 = vmatpush3.bf16.msra.mxu1 %v6465_v42 }
  0xe2   : > { %5138 = vmatprep.subr.bf16.mxu0 %v6164_v1  ;;  %5228 = vmatprep.subr.bf16.mxu1 %v6164_v1 }
  0xe5   : > { %5139 = vmatpush3.bf16.msra.mxu0 %v6476_v43  ;;  %5229 = vmatpush3.bf16.msra.mxu1 %v6483_v44 }
  0xe6   : > { %5140 = vmatprep.subr.bf16.mxu0 %v6164_v1  ;;  %5230 = vmatprep.subr.bf16.mxu1 %v6164_v1 }
  0xe9   : > { %5141 = vmatpush3.bf16.msra.mxu0 %v6489_v45  ;;  %5231 = vmatpush3.bf16.msra.mxu1 %v6495_v46 }
  0xea   : > { %5142 = vmatprep.subr.bf16.mxu0 %v6164_v1  ;;  %5232 = vmatprep.subr.bf16.mxu1 %v6164_v1 }
  0xed   : > { %5143 = vmatpush3.bf16.msra.mxu0 %v6509_v49  ;;  %5233 = vmatpush3.bf16.msra.mxu1 %v6521_v52  ;;  %v7021_v49 = vld [vmem:[%s7911_s3 + $0x38] sm:$0xff]   ;;  %v7026_v52 = vld [vmem:[%s7911_s3 + $0x128] sm:$0xff]  }
  0xee   : > { %5144 = vmatprep.subr.bf16.mxu0 %v6164_v1  ;;  %5234 = vmatprep.subr.bf16.mxu1 %v6164_v1 }
  0xf1   : > { %5145 = vmatpush3.bf16.msra.mxu0 %v6532_v54  ;;  %5235 = vmatpush3.bf16.msra.mxu1 %v6540_v56  ;;  %v7035_v54 = vld [vmem:[%s7911_s3 + $0x40] sm:$0xff]   ;;  %v7040_v56 = vld [vmem:[%s7911_s3 + $0x130] sm:$0xff]  }
  0xf2   : > { %5146 = vmatprep.subr.bf16.mxu0 %v6164_v1  ;;  %5236 = vmatprep.subr.bf16.mxu1 %v6164_v1 }
  0xf5   : > { %5147 = vmatpush3.bf16.msra.mxu0 %v6543_v57  ;;  %5237 = vmatpush3.bf16.msra.mxu1 %v6546_v58  ;;  %v7049_v57 = vld [vmem:[%s7911_s3 + $0x48] sm:$0xff]   ;;  %v7054_v58 = vld [vmem:[%s7911_s3 + $0x138] sm:$0xff]  }
  0xf6   : > { %5152 = vmatprep.subr.bf16.mxu0 %v6164_v1  ;;  %5242 = vmatprep.subr.bf16.mxu1 %v6164_v1 }
  0xf8   : > { %5149 = vmatmul.mubr.msk.bf16.vlgmr.msra.gmra.mrb[4].mxu0 %vm479_vm2, %v6675_v21  ;;  %5239 = vmatmul.mubr.msk.bf16.vlgmr.msra.gmra.mrb[4].mxu1 %vm479_vm2, %v6675_v21 }
  0xf9   : > { %5153 = vmatpush3.bf16.msra.mxu0 %v6573_v2  ;;  %5243 = vmatpush3.bf16.msra.mxu1 %v6580_v4 }
  0xfa   : > { %5154 = vmatprep.subr.bf16.mxu0 %v6164_v1  ;;  %5244 = vmatprep.subr.bf16.mxu1 %v6164_v1 }
  0xfb   : > { %5166 = vmatprep.mubr.msk.bf16.mxu0 %vm6165_vm0, %v6164_v1  ;;  %5256 = vmatprep.mubr.msk.bf16.mxu1 %vm6165_vm0, %v6164_v1 }
  0xfd   : > { %5155 = vmatpush3.bf16.msra.mxu0 %v6589_v5  ;;  %5245 = vmatpush3.bf16.msra.mxu1 %v6596_v6 }
  0xfe   : > { %5156 = vmatprep.subr.bf16.mxu0 %v6164_v1  ;;  %5246 = vmatprep.subr.bf16.mxu1 %v6164_v1 }
 0x101   : > { %5157 = vmatpush3.bf16.msra.mxu0 %v6607_v7  ;;  %5247 = vmatpush3.bf16.msra.mxu1 %v6614_v8  ;;  %v4309_v7 = vld [vmem:[%s7910_s2] ss:$0 sm:$0xff] }
 0x102   : > { %5158 = vmatprep.subr.bf16.mxu0 %v6164_v1  ;;  %5248 = vmatprep.subr.bf16.mxu1 %v6164_v1 }
 0x105   : > { %5159 = vmatpush3.bf16.msra.mxu0 %v6625_v9  ;;  %5249 = vmatpush3.bf16.msra.mxu1 %v6630_v10 }
 0x106   : > { %5160 = vmatprep.subr.bf16.mxu0 %v6164_v1  ;;  %5250 = vmatprep.subr.bf16.mxu1 %v6164_v1 }
 0x109   : > { %5161 = vmatpush3.bf16.msra.mxu0 %v6639_v11  ;;  %5251 = vmatpush3.bf16.msra.mxu1 %v6644_v12 }
 0x10a   : > { %5162 = vmatprep.subr.bf16.mxu0 %v6164_v1  ;;  %5252 = vmatprep.subr.bf16.mxu1 %v6164_v1 }
 0x10d   : > { %5163 = vmatpush3.bf16.msra.mxu0 %v6653_v13  ;;  %5253 = vmatpush3.bf16.msra.mxu1 %v6658_v14 }
 0x10e   : > { %5164 = vmatprep.subr.bf16.mxu0 %v6164_v1  ;;  %5254 = vmatprep.subr.bf16.mxu1 %v6164_v1 }
 0x111   : > { %5165 = vmatpush3.bf16.msra.mxu0 %v6549_v59  ;;  %5255 = vmatpush3.bf16.msra.mxu1 %v6552_v60  ;;  %v7063_v59 = vld [vmem:[%s7911_s3 + $0x50] sm:$0xff]   ;;  %v7068_v60 = vld [vmem:[%s7911_s3 + $0x140] sm:$0xff]  }
 0x112   : > { %5170 = vmatprep.subr.bf16.mxu0 %v6164_v1  ;;  %5260 = vmatprep.subr.bf16.mxu1 %v6164_v1 }
 0x114   : > { %5167 = vmatmul.mubr.msk.bf16.vlgmr.msra.gmra.mrb[4].mxu0 %vm479_vm2, %v6770_v50  ;;  %5257 = vmatmul.mubr.msk.bf16.vlgmr.msra.gmra.mrb[4].mxu1 %vm479_vm2, %v6770_v50  ;;  %v7146_v50 = vld [vmem:[%s7911_s3 + $0x18] sm:$0xff]  }
 0x115   : > { %5171 = vmatpush3.bf16.msra.mxu0 %v6673_v20  ;;  %5261 = vmatpush3.bf16.msra.mxu1 %v6680_v22 }
 0x116   : > { %5172 = vmatprep.subr.bf16.mxu0 %v6164_v1  ;;  %5262 = vmatprep.subr.bf16.mxu1 %v6164_v1 }
 0x117   : > { %5184 = vmatprep.mubr.msk.bf16.mxu0 %vm6165_vm0, %v6164_v1  ;;  %5274 = vmatprep.mubr.msk.bf16.mxu1 %vm6165_vm0, %v6164_v1 }
 0x119   : > { %5173 = vmatpush3.bf16.msra.mxu0 %v6689_v23  ;;  %5263 = vmatpush3.bf16.msra.mxu1 %v6696_v24 }
 0x11a   : > { %5174 = vmatprep.subr.bf16.mxu0 %v6164_v1  ;;  %5264 = vmatprep.subr.bf16.mxu1 %v6164_v1 }
 0x11d   : > { %5175 = vmatpush3.bf16.msra.mxu0 %v6707_v25  ;;  %5265 = vmatpush3.bf16.msra.mxu1 %v6714_v26  ;;  %v7096_v26 = vld [vmem:[%s7911_s3] sm:$0xff]  }
 0x11e   : > { %5176 = vmatprep.subr.bf16.mxu0 %v6164_v1  ;;  %5266 = vmatprep.subr.bf16.mxu1 %v6164_v1 }
 0x121   : > { %5177 = vmatpush3.bf16.msra.mxu0 %v6725_v27  ;;  %5267 = vmatpush3.bf16.msra.mxu1 %v6730_v32  ;;  %v7101_v27 = vld [vmem:[%s7911_s3 + $0xf0] sm:$0xff]  }
 0x122   : > { %5178 = vmatprep.subr.bf16.mxu0 %v6164_v1  ;;  %5268 = vmatprep.subr.bf16.mxu1 %v6164_v1 }
 0x125   : > { %5179 = vmatpush3.bf16.msra.mxu0 %v6739_v33  ;;  %5269 = vmatpush3.bf16.msra.mxu1 %v6744_v34  ;;  %v7114_v33 = vld [vmem:[%s7911_s3 + $0x8] sm:$0xff]   ;;  %v7119_v34 = vld [vmem:[%s7911_s3 + $0xf8] sm:$0xff]  }
 0x126   : > { %5180 = vmatprep.subr.bf16.mxu0 %v6164_v1  ;;  %5270 = vmatprep.subr.bf16.mxu1 %v6164_v1 }
 0x129   : > { %5181 = vmatpush3.bf16.msra.mxu0 %v6753_v35  ;;  %5271 = vmatpush3.bf16.msra.mxu1 %v6758_v38  ;;  %v7132_v35 = vld [vmem:[%s7911_s3 + $0x10] sm:$0xff]   ;;  %v7137_v38 = vld [vmem:[%s7911_s3 + $0x100] sm:$0xff]  }
 0x12a   : > { %5182 = vmatprep.subr.bf16.mxu0 %v6164_v1  ;;  %5272 = vmatprep.subr.bf16.mxu1 %v6164_v1 }
 0x12d   : > { %5183 = vmatpush3.bf16.msra.mxu0 %v6556_v61  ;;  %5273 = vmatpush3.bf16.msra.mxu1 %v6559_v62  ;;  %v7075_v61 = vld [vmem:[%s7911_s3 + $0x58] sm:$0xff]   ;;  %v7080_v62 = vld [vmem:[%s7911_s3 + $0x148] sm:$0xff]  }
 0x12e   : > { %5278 = vmatprep.subr.bf16.mxu0 %v6164_v1  ;;  %5358 = vmatprep.subr.bf16.mxu1 %v6164_v1 }
 0x130   : > { %5185 = vmatmul.mubr.msk.bf16.vlgmr.msra.gmra.mrb[4].mxu0 %vm479_vm2, %v1443_v29  ;;  %5275 = vmatmul.mubr.msk.bf16.vlgmr.msra.gmra.mrb[4].mxu1 %vm479_vm2, %v1443_v29  ;;  %v7241_v29 = vld [vmem:[%s7911_s3 + $0x168] sm:$0xff]  }
 0x131   : > { %5279 = vmatpush3.bf16.msra.mxu0 %v6998_v30  ;;  %5359 = vmatpush3.bf16.msra.mxu1 %v7005_v31 }
 0x132   : > { %5280 = vmatprep.subr.bf16.mxu0 %v6164_v1  ;;  %5360 = vmatprep.subr.bf16.mxu1 %v6164_v1 }
 0x133   : > { %5290 = vmatprep.mubr.msk.bf16.mxu0 %vm6165_vm0, %v6164_v1  ;;  %5370 = vmatprep.mubr.msk.bf16.mxu1 %vm6165_vm0, %v6164_v1 }
 0x135   : > { %5281 = vmatpush3.bf16.msra.mxu0 %v7021_v49  ;;  %5361 = vmatpush3.bf16.msra.mxu1 %v7026_v52 }
 0x136   : > { %5282 = vmatprep.subr.bf16.mxu0 %v6164_v1  ;;  %5362 = vmatprep.subr.bf16.mxu1 %v6164_v1 }
 0x139   : > { %5283 = vmatpush3.bf16.msra.mxu0 %v7035_v54  ;;  %5363 = vmatpush3.bf16.msra.mxu1 %v7040_v56 }
 0x13a   : > { %5284 = vmatprep.subr.bf16.mxu0 %v6164_v1  ;;  %5364 = vmatprep.subr.bf16.mxu1 %v6164_v1 }
 0x13d   : > { %5285 = vmatpush3.bf16.msra.mxu0 %v7049_v57  ;;  %5365 = vmatpush3.bf16.msra.mxu1 %v7054_v58 }
 0x13e   : > { %5286 = vmatprep.subr.bf16.mxu0 %v6164_v1  ;;  %5366 = vmatprep.subr.bf16.mxu1 %v6164_v1 }
 0x141   : > { %5287 = vmatpush3.bf16.msra.mxu0 %v7063_v59  ;;  %5367 = vmatpush3.bf16.msra.mxu1 %v7068_v60 }
 0x142   : > { %5288 = vmatprep.subr.bf16.mxu0 %v6164_v1  ;;  %5368 = vmatprep.subr.bf16.mxu1 %v6164_v1 }
 0x145   : > { %5289 = vmatpush3.bf16.msra.mxu0 %v7075_v61  ;;  %5369 = vmatpush3.bf16.msra.mxu1 %v7080_v62 }
 0x146   : > { %5294 = vmatprep.subr.bf16.mxu0 %v6164_v1  ;;  %5374 = vmatprep.subr.bf16.mxu1 %v6164_v1 }
 0x177   : > { %v922_v36 = vpop.f32.mrb[0].mxu0  ;;  %v1428_v37 = vpop.f32.mrb[0].mxu1 }
 0x178   : > { %v5006_v39 = vpop.f32.mrb[1].mxu0  ;;  %v1437_v40 = vmax.f32 %v922_v36, %v1428_v37  ;;  %v5096_v41 = vpop.f32.mrb[1].mxu1  ;;  %v7250_v36 = vld [vmem:[%s7911_s3 + $0x80] sm:$0xff]   ;;  %v7255_v37 = vld [vmem:[%s7911_s3 + $0x170] sm:$0xff]  }
 0x179   : > { %v925_v42 = vpop.f32.mrb[2].mxu0  ;;  %v1431_v43 = vpop.f32.mrb[2].mxu1  ;;  %v7264_v39 = vld [vmem:[%s7911_s3 + $0x88] sm:$0xff]  }
 0x17a   : > { %v5007_v44 = vpop.f32.mrb[3].mxu0  ;;  %v1438_v45 = vmax.f32 %v925_v42, %v1431_v43  ;;  %v5097_v46 = vpop.f32.mrb[3].mxu1  ;;  %v7278_v42 = vld [vmem:[%s7911_s3 + $0x90] sm:$0xff]   ;;  %v7283_v43 = vld [vmem:[%s7911_s3 + $0x180] sm:$0xff]  }
 0x17b   : > { %v7303_v46 = vld [vmem:[%s7911_s3 + $0x188] sm:$0xff]  }
 0x203   : > { %v1649_v2 = vpop.f32.mrb[4].mxu0  ;;  %v1862_v5 = vpop.f32.mrb[4].mxu1 }
 0x204   : > { %v1658_v4 = vmax.f32 %v1437_v40, %v1649_v2  ;;  %v5186_v6 = vpop.f32.mrb[5].mxu0  ;;  %v5276_v8 = vpop.f32.mrb[5].mxu1  ;;  %v7269_v40 = vld [vmem:[%s7911_s3 + $0x178] sm:$0xff]   ;;  %v7316_v2 = vld [vmem:[%s7911_s3 + $0xa0] sm:$0xff]  }
 0x205   : > { %v1652_v9 = vpop.f32.mrb[6].mxu0  ;;  %v1865_v12 = vpop.f32.mrb[6].mxu1  ;;  %v7335_v6 = vld [vmem:[%s7911_s3 + $0x198] sm:$0xff]   ;;  %v7349_v8 = vld [vmem:[%s7911_s3 + $0x1a0] sm:$0xff]  }
 0x206   : > { %v1871_v10 = vmax.f32 %v1658_v4, %v1862_v5  ;;  %v1659_v11 = vmax.f32 %v1438_v45, %v1652_v9  ;;  %v5187_v13 = vpop.f32.mrb[7].mxu0  ;;  %v5277_v14 = vpop.f32.mrb[7].mxu1  ;;  %v7298_v45 = vld [vmem:[%s7911_s3 + $0x98] sm:$0xff]   ;;  %v7321_v4 = vld [vmem:[%s7911_s3 + $0x190] sm:$0xff]   ;;  %v7330_v5 = vld [vmem:[%s7911_s3 + $0xa8] sm:$0xff]  }
 0x207   : > { %v7358_v9 = vld [vmem:[%s7911_s3 + $0xb8] sm:$0xff]   ;;  %v7377_v13 = vld [vmem:[%s7911_s3 + $0x1b0] sm:$0xff]  }
 0x208   : > { %v1880_v20 = vadd.f32 %v4309_v7, %v1871_v10  ;;  %v1872_v21 = vmax.f32 %v1659_v11, %v1865_v12  ;;  %v7363_v10 = vld [vmem:[%s7911_s3 + $0x1a8] sm:$0xff]   ;;  %v7372_v12 = vld [vmem:[%s7911_s3 + $0xc0] sm:$0xff]  }
 0x20a   : > { %v1882_v22 = vmax.f32 %v1880_v20, 0.0  ;;  %v1881_v23 = vadd.f32 %v4309_v7, %v1872_v21  ;;  %v7344_v7 = vld [vmem:[%s7911_s3 + $0xb0] sm:$0xff]   ;;  %v7392_v20 = vld [vmem:[%s7911_s3 + $0xc8] sm:$0xff]   ;;  %v7397_v21 = vld [vmem:[%s7911_s3 + $0x1b8] sm:$0xff]  }
 0x20c   : > { %1885 = vst.msk [vmem:[#allocation2] sm:$0xff] %vm1884_vm3, %v1882_v22  ;;  %v1883_v24 = vmax.f32 %v1881_v23, 0.0  ;;  %v7410_v22 = vld [vmem:[%s7911_s3 + $0xd0] sm:$0xff]   ;;  %v7415_v23 = vld [vmem:[%s7911_s3 + $0x1c0] sm:$0xff]  }
 0x20e   : > { %1886 = vst.msk [vmem:[#allocation2 + $0x8] sm:$0xff] %vm1884_vm3, %v1883_v24  ;;  %v7424_v24 = vld [vmem:[%s7911_s3 + $0xd8] sm:$0xff]  }
 0x215   : > { %v1890_v25 = vld [vmem:[#allocation2 + $0x1] ss:$2 sm:$0x3f]  ;;  %v1887_v17 = vld [vmem:[#allocation2] ss:$2 sm:$0x3f] }
 0x216   : > { %v7103_v32 = vpack.c.bf16 %v1890_v25, %v1890_v25  ;;  %v1888_v0 = vpack.c.bf16 %v1887_v17, %v1887_v17  ;;  %v1893_v41 = vld [vmem:[#allocation2 + $0x2] ss:$2 sm:$0x3f]  ;;  %v1896_v11 = vld [vmem:[#allocation2 + $0x3] ss:$2 sm:$0x3f] }
 0x217   : > { %v7285_v44 = vpack.c.bf16 %v1893_v41, %v1893_v41  ;;  %v7379_v14 = vpack.c.bf16 %v1896_v11, %v1896_v11  ;;  %v7429_v25 = vld [vmem:[%s7911_s3 + $0x1c8] sm:$0xff]   ;;  %v7438_v17 = vld [vmem:[%s7911_s3 + $0xe0] sm:$0xff]   ;;  %v7457_v11 = vld [vmem:[%s7911_s3 + $0x1d8] sm:$0xff]  }
 0x218   : > { %5291 = vmatmul.mubr.msk.bf16.vlgmr.msra.gmra.mrb[8].mxu0 %vm1884_vm3, %v7103_v32  ;;  %5371 = vmatmul.mubr.msk.bf16.vlgmr.msra.gmra.mrb[8].mxu1 %vm1884_vm3, %v7103_v32  ;;  %7926 = vst [vmem:[#allocation7_spill] sm:$0xff] %v7429_v25  ;;  %v7452_v41 = vld [vmem:[%s7911_s3 + $0xe8] sm:$0xff]  }
 0x219   : > { %5295 = vmatpush3.bf16.msra.mxu0 %v7096_v26  ;;  %5375 = vmatpush3.bf16.msra.mxu1 %v7101_v27 }
 0x21a   : > { %5296 = vmatprep.subr.bf16.mxu0 %v6164_v1  ;;  %5376 = vmatprep.subr.bf16.mxu1 %v6164_v1 }
 0x21b   : > { %5306 = vmatprep.mubr.msk.bf16.mxu0 %vm6165_vm0, %v6164_v1  ;;  %5386 = vmatprep.mubr.msk.bf16.mxu1 %vm6165_vm0, %v6164_v1 }
 0x21d   : > { %5297 = vmatpush3.bf16.msra.mxu0 %v7114_v33  ;;  %5377 = vmatpush3.bf16.msra.mxu1 %v7119_v34 }
 0x21e   : > { %5298 = vmatprep.subr.bf16.mxu0 %v6164_v1  ;;  %5378 = vmatprep.subr.bf16.mxu1 %v6164_v1 }
 0x221   : > { %5299 = vmatpush3.bf16.msra.mxu0 %v7132_v35  ;;  %5379 = vmatpush3.bf16.msra.mxu1 %v7137_v38 }
 0x222   : > { %5300 = vmatprep.subr.bf16.mxu0 %v6164_v1  ;;  %5380 = vmatprep.subr.bf16.mxu1 %v6164_v1 }
 0x225   : > { %5301 = vmatpush3.bf16.msra.mxu0 %v7146_v50  ;;  %5381 = vmatpush3.bf16.msra.mxu1 %v7151_v48 }
 0x226   : > { %5302 = vmatprep.subr.bf16.mxu0 %v6164_v1  ;;  %5382 = vmatprep.subr.bf16.mxu1 %v6164_v1 }
 0x229   : > { %5303 = vmatpush3.bf16.msra.mxu0 %v7160_v51  ;;  %5383 = vmatpush3.bf16.msra.mxu1 %v7165_v53 }
 0x22a   : > { %5304 = vmatprep.subr.bf16.mxu0 %v6164_v1  ;;  %5384 = vmatprep.subr.bf16.mxu1 %v6164_v1 }
 0x22d   : > { %5305 = vmatpush3.bf16.msra.mxu0 %v7174_v55  ;;  %5385 = vmatpush3.bf16.msra.mxu1 %v7179_v63 }
 0x22e   : > { %5310 = vmatprep.subr.bf16.mxu0 %v6164_v1  ;;  %5390 = vmatprep.subr.bf16.mxu1 %v6164_v1 }
 0x230   : > { %5307 = vmatmul.mubr.msk.bf16.vlgmr.msra.gmra.mrb[8].mxu0 %vm1884_vm3, %v1888_v0  ;;  %5387 = vmatmul.mubr.msk.bf16.vlgmr.msra.gmra.mrb[8].mxu1 %vm1884_vm3, %v1888_v0  ;;  %v7443_v0 = vld [vmem:[%s7911_s3 + $0x1d0] sm:$0xff]  }
 0x231   : > { %5311 = vmatpush3.bf16.msra.mxu0 %v7188_v18  ;;  %5391 = vmatpush3.bf16.msra.mxu1 %v7193_v3  ;;  %7927 = vst [vmem:[#allocation8_spill] sm:$0xff] %v7443_v0 }
 0x232   : > { %5312 = vmatprep.subr.bf16.mxu0 %v6164_v1  ;;  %5392 = vmatprep.subr.bf16.mxu1 %v6164_v1 }
 0x233   : > { %5322 = vmatprep.mubr.msk.bf16.mxu0 %vm6165_vm0, %v6164_v1  ;;  %5402 = vmatprep.mubr.msk.bf16.mxu1 %vm6165_vm0, %v6164_v1 }
 0x235   : > { %5313 = vmatpush3.bf16.msra.mxu0 %v7204_v15  ;;  %5393 = vmatpush3.bf16.msra.mxu1 %v7209_v16 }
 0x236   : > { %5314 = vmatprep.subr.bf16.mxu0 %v6164_v1  ;;  %5394 = vmatprep.subr.bf16.mxu1 %v6164_v1 }
 0x239   : > { %5315 = vmatpush3.bf16.msra.mxu0 %v7222_v47  ;;  %5395 = vmatpush3.bf16.msra.mxu1 %v7227_v19 }
 0x23a   : > { %5316 = vmatprep.subr.bf16.mxu0 %v6164_v1  ;;  %5396 = vmatprep.subr.bf16.mxu1 %v6164_v1 }
 0x23d   : > { %5317 = vmatpush3.bf16.msra.mxu0 %v7236_v28  ;;  %5397 = vmatpush3.bf16.msra.mxu1 %v7241_v29 }
 0x23e   : > { %5318 = vmatprep.subr.bf16.mxu0 %v6164_v1  ;;  %5398 = vmatprep.subr.bf16.mxu1 %v6164_v1 }
 0x241   : > { %5319 = vmatpush3.bf16.msra.mxu0 %v7250_v36  ;;  %5399 = vmatpush3.bf16.msra.mxu1 %v7255_v37 }
 0x242   : > { %5320 = vmatprep.subr.bf16.mxu0 %v6164_v1  ;;  %5400 = vmatprep.subr.bf16.mxu1 %v6164_v1 }
 0x245   : > { %5321 = vmatpush3.bf16.msra.mxu0 %v7264_v39  ;;  %5401 = vmatpush3.bf16.msra.mxu1 %v7269_v40 }
 0x246   : > { %5326 = vmatprep.subr.bf16.mxu0 %v6164_v1  ;;  %5406 = vmatprep.subr.bf16.mxu1 %v6164_v1 }
 0x248   : > { %5323 = vmatmul.mubr.msk.bf16.vlgmr.msra.gmra.mrb[8].mxu0 %vm1884_vm3, %v7285_v44  ;;  %5403 = vmatmul.mubr.msk.bf16.vlgmr.msra.gmra.mrb[8].mxu1 %vm1884_vm3, %v7285_v44 }
 0x249   : > { %5327 = vmatpush3.bf16.msra.mxu0 %v7278_v42  ;;  %5407 = vmatpush3.bf16.msra.mxu1 %v7283_v43 }
 0x24a   : > { %5328 = vmatprep.subr.bf16.mxu0 %v6164_v1  ;;  %5408 = vmatprep.subr.bf16.mxu1 %v6164_v1 }
 0x24b   : > { %5338 = vmatprep.mubr.msk.bf16.mxu0 %vm6165_vm0, %v6164_v1  ;;  %5418 = vmatprep.mubr.msk.bf16.mxu1 %vm6165_vm0, %v6164_v1 }
 0x24d   : > { %5329 = vmatpush3.bf16.msra.mxu0 %v7298_v45  ;;  %5409 = vmatpush3.bf16.msra.mxu1 %v7303_v46 }
 0x24e   : > { %5330 = vmatprep.subr.bf16.mxu0 %v6164_v1  ;;  %5410 = vmatprep.subr.bf16.mxu1 %v6164_v1 }
 0x251   : > { %5331 = vmatpush3.bf16.msra.mxu0 %v7316_v2  ;;  %5411 = vmatpush3.bf16.msra.mxu1 %v7321_v4 }
 0x252   : > { %5332 = vmatprep.subr.bf16.mxu0 %v6164_v1  ;;  %5412 = vmatprep.subr.bf16.mxu1 %v6164_v1 }
 0x255   : > { %5333 = vmatpush3.bf16.msra.mxu0 %v7330_v5  ;;  %5413 = vmatpush3.bf16.msra.mxu1 %v7335_v6 }
 0x256   : > { %5334 = vmatprep.subr.bf16.mxu0 %v6164_v1  ;;  %5414 = vmatprep.subr.bf16.mxu1 %v6164_v1 }
 0x259   : > { %5335 = vmatpush3.bf16.msra.mxu0 %v7344_v7  ;;  %5415 = vmatpush3.bf16.msra.mxu1 %v7349_v8 }
 0x25a   : > { %5336 = vmatprep.subr.bf16.mxu0 %v6164_v1  ;;  %5416 = vmatprep.subr.bf16.mxu1 %v6164_v1 }
 0x25d   : > { %5337 = vmatpush3.bf16.msra.mxu0 %v7358_v9  ;;  %5417 = vmatpush3.bf16.msra.mxu1 %v7363_v10 }
 0x25e   : > { %5342 = vmatprep.subr.bf16.mxu0 %v6164_v1  ;;  %5422 = vmatprep.subr.bf16.mxu1 %v6164_v1 }
 0x260   : > { %5339 = vmatmul.mubr.msk.bf16.vlgmr.msra.gmra.mrb[8].mxu0 %vm1884_vm3, %v7379_v14  ;;  %5419 = vmatmul.mubr.msk.bf16.vlgmr.msra.gmra.mrb[8].mxu1 %vm1884_vm3, %v7379_v14 }
 0x261   : > { %5343 = vmatpush3.bf16.msra.mxu0 %v7372_v12  ;;  %5423 = vmatpush3.bf16.msra.mxu1 %v7377_v13 }
 0x262   : > { %5344 = vmatprep.subr.bf16.mxu0 %v6164_v1  ;;  %5424 = vmatprep.subr.bf16.mxu1 %v6164_v1 }
 0x263   : > { %5354 = vmatprep.mubr.msk.bf16.mxu0 %vm6165_vm0, %v6164_v1  ;;  %5434 = vmatprep.mubr.msk.bf16.mxu1 %vm6165_vm0, %v6164_v1 }
 0x265   : > { %5345 = vmatpush3.bf16.msra.mxu0 %v7392_v20  ;;  %5425 = vmatpush3.bf16.msra.mxu1 %v7397_v21 }
 0x266   : > { %5346 = vmatprep.subr.bf16.mxu0 %v6164_v1  ;;  %5426 = vmatprep.subr.bf16.mxu1 %v6164_v1 }
 0x269   : > { %5347 = vmatpush3.bf16.msra.mxu0 %v7410_v22  ;;  %5427 = vmatpush3.bf16.msra.mxu1 %v7415_v23 }
 0x26a   : > { %5348 = vmatprep.subr.bf16.mxu0 %v6164_v1  ;;  %5428 = vmatprep.subr.bf16.mxu1 %v6164_v1 }
 0x26d   : > { %5349 = vmatpush3.bf16.msra.mxu0 %v7424_v24  ;;  %5429 = vmatpush3.bf16.msra.mxu1 %v7429_v25  ;;  %v1899_v25 = vld [vmem:[#allocation2 + $0x4] ss:$2 sm:$0x3f] }
 0x26e   : > { %5350 = vmatprep.subr.bf16.mxu0 %v6164_v1  ;;  %5430 = vmatprep.subr.bf16.mxu1 %v6164_v1 }
 0x271   : > { %5351 = vmatpush3.bf16.msra.mxu0 %v7438_v17  ;;  %5431 = vmatpush3.bf16.msra.mxu1 %v7443_v0  ;;  %v7463_v0 = vpack.c.bf16 %v1899_v25, %v1899_v25 }
 0x272   : > { %5352 = vmatprep.subr.bf16.mxu0 %v6164_v1  ;;  %5432 = vmatprep.subr.bf16.mxu1 %v6164_v1 }
 0x275   : > { %5353 = vmatpush3.bf16.msra.mxu0 %v7452_v41  ;;  %5433 = vmatpush3.bf16.msra.mxu1 %v7457_v11 }
 0x276   : > { %5438 = vmatprep.subr.bf16.mxu0 %v6164_v1  ;;  %5518 = vmatprep.subr.bf16.mxu1 %v6164_v1 }
 0x278   : > { %5355 = vmatmul.mubr.msk.bf16.vlgmr.msra.gmra.mrb[8].mxu0 %vm1884_vm3, %v7463_v0  ;;  %5435 = vmatmul.mubr.msk.bf16.vlgmr.msra.gmra.mrb[8].mxu1 %vm1884_vm3, %v7463_v0 }
 0x279   : > { %5439 = vmatpush3.bf16.msra.mxu0 %v6998_v30  ;;  %5519 = vmatpush3.bf16.msra.mxu1 %v7005_v31  ;;  %v7928_v30 = vld [vmem:[#allocation7_spill] sm:$0xff]  ;;  %v7929_v31 = vld [vmem:[#allocation8_spill] sm:$0xff] }
 0x27a   : > { %5440 = vmatprep.subr.bf16.mxu0 %v6164_v1  ;;  %5520 = vmatprep.subr.bf16.mxu1 %v6164_v1 }
 0x27b   : > { %5450 = vmatprep.mubr.msk.bf16.mxu0 %vm6165_vm0, %v6164_v1  ;;  %5530 = vmatprep.mubr.msk.bf16.mxu1 %vm6165_vm0, %v6164_v1 }
 0x27d   : > { %5441 = vmatpush3.bf16.msra.mxu0 %v7021_v49  ;;  %5521 = vmatpush3.bf16.msra.mxu1 %v7026_v52  ;;  %v2813_v49 = vld [vmem:[#allocation2 + $0x5] ss:$2 sm:$0x3f]  ;;  %v6030_v52 = vld [vmem:[%s7913_s5 + $0x30] sm:$0xff]  }
 0x27e   : > { %5442 = vmatprep.subr.bf16.mxu0 %v6164_v1  ;;  %5522 = vmatprep.subr.bf16.mxu1 %v6164_v1 }
 0x281   : > { %5443 = vmatpush3.bf16.msra.mxu0 %v7035_v54  ;;  %5523 = vmatpush3.bf16.msra.mxu1 %v7040_v56  ;;  %v6031_v54 = vld [vmem:[%s7913_s5] sm:$0xff]   ;;  %v2814_v56 = vpack.c.bf16 %v2813_v49, %v2813_v49  ;;  %v6061_v49 = vld [vmem:[%s7913_s5 + $0x108] sm:$0xff]  }
 0x282   : > { %5444 = vmatprep.subr.bf16.mxu0 %v6164_v1  ;;  %5524 = vmatprep.subr.bf16.mxu1 %v6164_v1 }
 0x285   : > { %5445 = vmatpush3.bf16.msra.mxu0 %v7049_v57  ;;  %5525 = vmatpush3.bf16.msra.mxu1 %v7054_v58  ;;  %v6032_v57 = vld [vmem:[%s7913_s5 + $0x38] sm:$0xff]   ;;  %v6033_v58 = vld [vmem:[%s7913_s5 + $0x8] sm:$0xff]  }
 0x286   : > { %5446 = vmatprep.subr.bf16.mxu0 %v6164_v1  ;;  %5526 = vmatprep.subr.bf16.mxu1 %v6164_v1 }
 0x289   : > { %5447 = vmatpush3.bf16.msra.mxu0 %v7063_v59  ;;  %5527 = vmatpush3.bf16.msra.mxu1 %v7068_v60  ;;  %v6034_v59 = vld [vmem:[%s7913_s5 + $0x40] sm:$0xff]   ;;  %v6035_v60 = vld [vmem:[%s7913_s5 + $0x10] sm:$0xff]  }
 0x28a   : > { %5448 = vmatprep.subr.bf16.mxu0 %v6164_v1  ;;  %5528 = vmatprep.subr.bf16.mxu1 %v6164_v1 }
 0x28d   : > { %5449 = vmatpush3.bf16.msra.mxu0 %v7075_v61  ;;  %5529 = vmatpush3.bf16.msra.mxu1 %v7080_v62  ;;  %v6036_v61 = vld [vmem:[%s7913_s5 + $0x48] sm:$0xff]   ;;  %v6037_v62 = vld [vmem:[%s7913_s5 + $0x18] sm:$0xff]  }
 0x28e   : > { %5454 = vmatprep.subr.bf16.mxu0 %v6164_v1  ;;  %5534 = vmatprep.subr.bf16.mxu1 %v6164_v1 }
 0x290   : > { %5451 = vmatmul.mubr.msk.bf16.vlgmr.msra.gmra.mrb[12].mxu0 %vm1884_vm3, %v7285_v44  ;;  %5531 = vmatmul.mubr.msk.bf16.vlgmr.msra.gmra.mrb[12].mxu1 %vm1884_vm3, %v7285_v44 }
 0x291   : > { %5455 = vmatpush3.bf16.msra.mxu0 %v7096_v26  ;;  %5535 = vmatpush3.bf16.msra.mxu1 %v7101_v27 }
 0x292   : > { %5456 = vmatprep.subr.bf16.mxu0 %v6164_v1  ;;  %5536 = vmatprep.subr.bf16.mxu1 %v6164_v1 }
 0x293   : > { %5466 = vmatprep.mubr.msk.bf16.mxu0 %vm6165_vm0, %v6164_v1  ;;  %5546 = vmatprep.mubr.msk.bf16.mxu1 %vm6165_vm0, %v6164_v1 }
 0x295   : > { %5457 = vmatpush3.bf16.msra.mxu0 %v7114_v33  ;;  %5537 = vmatpush3.bf16.msra.mxu1 %v7119_v34 }
 0x296   : > { %5458 = vmatprep.subr.bf16.mxu0 %v6164_v1  ;;  %5538 = vmatprep.subr.bf16.mxu1 %v6164_v1 }
 0x299   : > { %5459 = vmatpush3.bf16.msra.mxu0 %v7132_v35  ;;  %5539 = vmatpush3.bf16.msra.mxu1 %v7137_v38  ;;  %v6038_v35 = vld [vmem:[%s7913_s5 + $0x50] sm:$0xff]   ;;  %v6039_v38 = vld [vmem:[%s7913_s5 + $0x20] sm:$0xff]  }
 0x29a   : > { %5460 = vmatprep.subr.bf16.mxu0 %v6164_v1  ;;  %5540 = vmatprep.subr.bf16.mxu1 %v6164_v1 }
 0x29d   : > { %5461 = vmatpush3.bf16.msra.mxu0 %v7146_v50  ;;  %5541 = vmatpush3.bf16.msra.mxu1 %v7151_v48 }
 0x29e   : > { %5462 = vmatprep.subr.bf16.mxu0 %v6164_v1  ;;  %5542 = vmatprep.subr.bf16.mxu1 %v6164_v1 }
 0x2a1   : > { %5463 = vmatpush3.bf16.msra.mxu0 %v7160_v51  ;;  %5543 = vmatpush3.bf16.msra.mxu1 %v7165_v53 }
 0x2a2   : > { %5464 = vmatprep.subr.bf16.mxu0 %v6164_v1  ;;  %5544 = vmatprep.subr.bf16.mxu1 %v6164_v1 }
 0x2a5   : > { %5465 = vmatpush3.bf16.msra.mxu0 %v7174_v55  ;;  %5545 = vmatpush3.bf16.msra.mxu1 %v7179_v63  ;;  %v6040_v55 = vld [vmem:[%s7913_s5 + $0x58] sm:$0xff]   ;;  %v6041_v63 = vld [vmem:[%s7913_s5 + $0x28] sm:$0xff]  }
 0x2a6   : > { %5470 = vmatprep.subr.bf16.mxu0 %v6164_v1  ;;  %5550 = vmatprep.subr.bf16.mxu1 %v6164_v1 }
 0x2a8   : > { %5467 = vmatmul.mubr.msk.bf16.vlgmr.msra.gmra.mrb[12].mxu0 %vm1884_vm3, %v7103_v32  ;;  %5547 = vmatmul.mubr.msk.bf16.vlgmr.msra.gmra.mrb[12].mxu1 %vm1884_vm3, %v7103_v32 }
 0x2a9   : > { %5471 = vmatpush3.bf16.msra.mxu0 %v7188_v18  ;;  %5551 = vmatpush3.bf16.msra.mxu1 %v7193_v3 }
 0x2aa   : > { %5472 = vmatprep.subr.bf16.mxu0 %v6164_v1  ;;  %5552 = vmatprep.subr.bf16.mxu1 %v6164_v1 }
 0x2ab   : > { %5482 = vmatprep.mubr.msk.bf16.mxu0 %vm6165_vm0, %v6164_v1  ;;  %5562 = vmatprep.mubr.msk.bf16.mxu1 %vm6165_vm0, %v6164_v1 }
 0x2ad   : > { %5473 = vmatpush3.bf16.msra.mxu0 %v7204_v15  ;;  %5553 = vmatpush3.bf16.msra.mxu1 %v7209_v16 }
 0x2ae   : > { %5474 = vmatprep.subr.bf16.mxu0 %v6164_v1  ;;  %5554 = vmatprep.subr.bf16.mxu1 %v6164_v1 }
 0x2b1   : > { %5475 = vmatpush3.bf16.msra.mxu0 %v7222_v47  ;;  %5555 = vmatpush3.bf16.msra.mxu1 %v7227_v19  ;;  %v4498_v19 = vld [vmem:[%s7912_s4] ss:$0 sm:$0xff] }
 0x2b2   : > { %5476 = vmatprep.subr.bf16.mxu0 %v6164_v1  ;;  %5556 = vmatprep.subr.bf16.mxu1 %v6164_v1 }
 0x2b5   : > { %5477 = vmatpush3.bf16.msra.mxu0 %v7236_v28  ;;  %5557 = vmatpush3.bf16.msra.mxu1 %v7241_v29 }
 0x2b6   : > { %5478 = vmatprep.subr.bf16.mxu0 %v6164_v1  ;;  %5558 = vmatprep.subr.bf16.mxu1 %v6164_v1 }
 0x2b9   : > { %5479 = vmatpush3.bf16.msra.mxu0 %v7250_v36  ;;  %5559 = vmatpush3.bf16.msra.mxu1 %v7255_v37 }
 0x2ba   : > { %5480 = vmatprep.subr.bf16.mxu0 %v6164_v1  ;;  %5560 = vmatprep.subr.bf16.mxu1 %v6164_v1 }
 0x2bd   : > { %5481 = vmatpush3.bf16.msra.mxu0 %v7264_v39  ;;  %5561 = vmatpush3.bf16.msra.mxu1 %v7269_v40 }
 0x2be   : > { %5486 = vmatprep.subr.bf16.mxu0 %v6164_v1  ;;  %5566 = vmatprep.subr.bf16.mxu1 %v6164_v1 }
 0x2c0   : > { %5483 = vmatmul.mubr.msk.bf16.vlgmr.msra.gmra.mrb[12].mxu0 %vm1884_vm3, %v7379_v14  ;;  %5563 = vmatmul.mubr.msk.bf16.vlgmr.msra.gmra.mrb[12].mxu1 %vm1884_vm3, %v7379_v14  ;;  %v6052_v14 = vld [vmem:[%s7913_s5 + $0x88] sm:$0xff]  }
 0x2c1   : > { %5487 = vmatpush3.bf16.msra.mxu0 %v7278_v42  ;;  %5567 = vmatpush3.bf16.msra.mxu1 %v7283_v43  ;;  %v6042_v43 = vld [vmem:[%s7913_s5 + $0x60] sm:$0xff]  }
 0x2c2   : > { %5488 = vmatprep.subr.bf16.mxu0 %v6164_v1  ;;  %5568 = vmatprep.subr.bf16.mxu1 %v6164_v1 }
 0x2c3   : > { %5498 = vmatprep.mubr.msk.bf16.mxu0 %vm6165_vm0, %v6164_v1  ;;  %5578 = vmatprep.mubr.msk.bf16.mxu1 %vm6165_vm0, %v6164_v1 }
 0x2c5   : > { %5489 = vmatpush3.bf16.msra.mxu0 %v7298_v45  ;;  %5569 = vmatpush3.bf16.msra.mxu1 %v7303_v46  ;;  %v6043_v46 = vld [vmem:[%s7913_s5 + $0x90] sm:$0xff]  }
 0x2c6   : > { %5490 = vmatprep.subr.bf16.mxu0 %v6164_v1  ;;  %5570 = vmatprep.subr.bf16.mxu1 %v6164_v1 }
 0x2c9   : > { %5491 = vmatpush3.bf16.msra.mxu0 %v7316_v2  ;;  %5571 = vmatpush3.bf16.msra.mxu1 %v7321_v4 }
 0x2ca   : > { %5492 = vmatprep.subr.bf16.mxu0 %v6164_v1  ;;  %5572 = vmatprep.subr.bf16.mxu1 %v6164_v1 }
 0x2cd   : > { %5493 = vmatpush3.bf16.msra.mxu0 %v7330_v5  ;;  %5573 = vmatpush3.bf16.msra.mxu1 %v7335_v6  ;;  %v6044_v5 = vld [vmem:[%s7913_s5 + $0x68] sm:$0xff]   ;;  %v6045_v6 = vld [vmem:[%s7913_s5 + $0x98] sm:$0xff]  }
 0x2ce   : > { %5494 = vmatprep.subr.bf16.mxu0 %v6164_v1  ;;  %5574 = vmatprep.subr.bf16.mxu1 %v6164_v1 }
 0x2d1   : > { %5495 = vmatpush3.bf16.msra.mxu0 %v7344_v7  ;;  %5575 = vmatpush3.bf16.msra.mxu1 %v7349_v8  ;;  %v6046_v7 = vld [vmem:[%s7913_s5 + $0x70] sm:$0xff]   ;;  %v6047_v8 = vld [vmem:[%s7913_s5 + $0xa0] sm:$0xff]  }
 0x2d2   : > { %5496 = vmatprep.subr.bf16.mxu0 %v6164_v1  ;;  %5576 = vmatprep.subr.bf16.mxu1 %v6164_v1 }
 0x2d5   : > { %5497 = vmatpush3.bf16.msra.mxu0 %v7358_v9  ;;  %5577 = vmatpush3.bf16.msra.mxu1 %v7363_v10  ;;  %v6048_v9 = vld [vmem:[%s7913_s5 + $0x78] sm:$0xff]   ;;  %v6049_v10 = vld [vmem:[%s7913_s5 + $0xa8] sm:$0xff]  }
 0x2d6   : > { %5502 = vmatprep.subr.bf16.mxu0 %v6164_v1  ;;  %5582 = vmatprep.subr.bf16.mxu1 %v6164_v1 }
 0x2d8   : > { %5499 = vmatmul.mubr.msk.bf16.vlgmr.msra.gmra.mrb[12].mxu0 %vm1884_vm3, %v7463_v0  ;;  %5579 = vmatmul.mubr.msk.bf16.vlgmr.msra.gmra.mrb[12].mxu1 %vm1884_vm3, %v7463_v0  ;;  %v6056_v0 = vld [vmem:[%s7913_s5 + $0xc8] sm:$0xff]  }
 0x2d9   : > { %5503 = vmatpush3.bf16.msra.mxu0 %v7372_v12  ;;  %5583 = vmatpush3.bf16.msra.mxu1 %v7377_v13  ;;  %v6050_v12 = vld [vmem:[%s7913_s5 + $0x80] sm:$0xff]   ;;  %v6051_v13 = vld [vmem:[%s7913_s5 + $0xb0] sm:$0xff]  }
 0x2da   : > { %5504 = vmatprep.subr.bf16.mxu0 %v6164_v1  ;;  %5584 = vmatprep.subr.bf16.mxu1 %v6164_v1 }
 0x2db   : > { %5514 = vmatprep.mubr.msk.bf16.mxu0 %vm6165_vm0, %v6164_v1  ;;  %5594 = vmatprep.mubr.msk.bf16.mxu1 %vm6165_vm0, %v6164_v1 }
 0x2dd   : > { %5505 = vmatpush3.bf16.msra.mxu0 %v7392_v20  ;;  %5585 = vmatpush3.bf16.msra.mxu1 %v7397_v21  ;;  %v6053_v20 = vld [vmem:[%s7913_s5 + $0xb8] sm:$0xff]  }
 0x2de   : > { %5506 = vmatprep.subr.bf16.mxu0 %v6164_v1  ;;  %5586 = vmatprep.subr.bf16.mxu1 %v6164_v1 }
 0x2e1   : > { %5507 = vmatpush3.bf16.msra.mxu0 %v7410_v22  ;;  %5587 = vmatpush3.bf16.msra.mxu1 %v7415_v23  ;;  %v6054_v23 = vld [vmem:[%s7913_s5 + $0xc0] sm:$0xff]  }
 0x2e2   : > { %5508 = vmatprep.subr.bf16.mxu0 %v6164_v1  ;;  %5588 = vmatprep.subr.bf16.mxu1 %v6164_v1 }
 0x2e5   : > { %5509 = vmatpush3.bf16.msra.mxu0 %v7424_v24  ;;  %5589 = vmatpush3.bf16.msra.mxu1 %v7928_v30  ;;  %v6055_v24 = vld [vmem:[%s7913_s5 + $0xf0] sm:$0xff]   ;;  %v6059_v30 = vld [vmem:[%s7913_s5 + $0x100] sm:$0xff]  }
 0x2e6   : > { %5510 = vmatprep.subr.bf16.mxu0 %v6164_v1  ;;  %5590 = vmatprep.subr.bf16.mxu1 %v6164_v1 }
 0x2e9   : > { %5511 = vmatpush3.bf16.msra.mxu0 %v7438_v17  ;;  %5591 = vmatpush3.bf16.msra.mxu1 %v7929_v31  ;;  %v6060_v31 = vld [vmem:[%s7913_s5 + $0xd8] sm:$0xff]  }
 0x2ea   : > { %5512 = vmatprep.subr.bf16.mxu0 %v6164_v1  ;;  %5592 = vmatprep.subr.bf16.mxu1 %v6164_v1 }
 0x2ed   : > { %5513 = vmatpush3.bf16.msra.mxu0 %v7452_v41  ;;  %5593 = vmatpush3.bf16.msra.mxu1 %v7457_v11  ;;  %v6057_v41 = vld [vmem:[%s7913_s5 + $0xf8] sm:$0xff]   ;;  %v6058_v11 = vld [vmem:[%s7913_s5 + $0xd0] sm:$0xff]  }
 0x2ee   : > { %5598 = vmatprep.subr.bf16.mxu0 %v6164_v1  ;;  %5614 = vmatprep.subr.bf16.mxu1 %v6164_v1 }
 0x2f0   : > { %5515 = vmatmul.mubr.msk.bf16.vlgmr.msra.gmra.mrb[12].mxu0 %vm1884_vm3, %v2814_v56  ;;  %5595 = vmatmul.mubr.msk.bf16.vlgmr.msra.gmra.mrb[12].mxu1 %vm1884_vm3, %v2814_v56  ;;  %v6064_v56 = vld [vmem:[%s7913_s5 + $0xe8] sm:$0xff]  }
 0x2f1   : > { %5599 = vmatpush3.bf16.msra.mxu0 %v6030_v52  ;;  %5615 = vmatpush3.bf16.msra.mxu1 %v6031_v54  ;;  %v6062_v52 = vld [vmem:[%s7913_s5 + $0xe0] sm:$0xff]   ;;  %v6063_v54 = vld [vmem:[%s7913_s5 + $0x110] sm:$0xff]  }
 0x2f2   : > { %5600 = vmatprep.subr.bf16.mxu0 %v6164_v1  ;;  %5616 = vmatprep.subr.bf16.mxu1 %v6164_v1 }
 0x2f3   : > { %5610 = vmatprep.mubr.msk.bf16.mxu0 %vm6165_vm0, %v6164_v1  ;;  %5626 = vmatprep.mubr.msk.bf16.mxu1 %vm6165_vm0, %v6164_v1 }
 0x2f5   : > { %5601 = vmatpush3.bf16.msra.mxu0 %v6032_v57  ;;  %5617 = vmatpush3.bf16.msra.mxu1 %v6033_v58  ;;  %v6065_v57 = vld [vmem:[%s7913_s5 + $0x118] sm:$0xff]  }
 0x2f6   : > { %5602 = vmatprep.subr.bf16.mxu0 %v6164_v1  ;;  %5618 = vmatprep.subr.bf16.mxu1 %v6164_v1 }
 0x2f9   : > { %5603 = vmatpush3.bf16.msra.mxu0 %v6034_v59  ;;  %5619 = vmatpush3.bf16.msra.mxu1 %v6035_v60 }
 0x2fa   : > { %5604 = vmatprep.subr.bf16.mxu0 %v6164_v1  ;;  %5620 = vmatprep.subr.bf16.mxu1 %v6164_v1 }
 0x2fd   : > { %5605 = vmatpush3.bf16.msra.mxu0 %v6036_v61  ;;  %5621 = vmatpush3.bf16.msra.mxu1 %v6037_v62  ;;  %v6066_v62 = vld [vmem:[%s7915_s7] sm:$0xff]  }
 0x2fe   : > { %5606 = vmatprep.subr.bf16.mxu0 %v6164_v1  ;;  %5622 = vmatprep.subr.bf16.mxu1 %v6164_v1 }
 0x301   : > { %5607 = vmatpush3.bf16.msra.mxu0 %v6038_v35  ;;  %5623 = vmatpush3.bf16.msra.mxu1 %v6039_v38  ;;  %v6072_v35 = vld [vmem:[%s7915_s7 + $0x30] sm:$0xff]   ;;  %v6073_v38 = vld [vmem:[%s7915_s7 + $0x38] ss:$0 sps:$4 sm:$0xff]  }
 0x302   : > { %5608 = vmatprep.subr.bf16.mxu0 %v6164_v1  ;;  %5624 = vmatprep.subr.bf16.mxu1 %v6164_v1 }
 0x305   : > { %5609 = vmatpush3.bf16.msra.mxu0 %v6040_v55  ;;  %5625 = vmatpush3.bf16.msra.mxu1 %v6041_v63  ;;  %v6077_v55 = vld [vmem:[%s7917_s9 + $0x18] sm:$0xff]  }
 0x306   : > { %5630 = vmatprep.subr.bf16.mxu0 %v6164_v1  ;;  %5646 = vmatprep.subr.bf16.mxu1 %v6164_v1 }
 0x34b   : > { %v2356_v26 = vpop.f32.mrb[8].mxu0  ;;  %v2804_v27 = vpop.f32.mrb[8].mxu1 }
 0x34c   : > { %v2811_v32 = vmax.f32 %v2356_v26, %v2804_v27  ;;  %v5356_v33 = vpop.f32.mrb[9].mxu0  ;;  %v5436_v34 = vpop.f32.mrb[9].mxu1  ;;  %v6067_v26 = vld [vmem:[%s7915_s7 + $0x8] sm:$0xff]   ;;  %v6068_v27 = vld [vmem:[%s7915_s7 + $0x10] sm:$0xff]  }
 0x34d   : > { %v2359_v50 = vpop.f32.mrb[10].mxu0  ;;  %v2807_v48 = vpop.f32.mrb[10].mxu1  ;;  %v6070_v33 = vld [vmem:[%s7915_s7 + $0x20] sm:$0xff]   ;;  %v6071_v34 = vld [vmem:[%s7915_s7 + $0x28] sm:$0xff]  }
 0x34e   : > { %v5357_v51 = vpop.f32.mrb[11].mxu0  ;;  %v5437_v53 = vpop.f32.mrb[11].mxu1  ;;  %v3870_v50 = vsel %vm3868_vm5, %v6073_v38, 0  ;;  %v6074_v48 = vld [vmem:[%s7917_s9] sm:$0xff]  }
 0x34f   : > { %v6075_v51 = vld [vmem:[%s7917_s9 + $0x8] sm:$0xff]   ;;  %v6076_v53 = vld [vmem:[%s7917_s9 + $0x10] sm:$0xff]  }
 0x3c3   : > { %v3014_v18 = vpop.f32.mrb[12].mxu0  ;;  %v3218_v3 = vpop.f32.mrb[12].mxu1 }
 0x3c4   : > { %v3021_v15 = vmax.f32 %v2811_v32, %v3014_v18  ;;  %v5516_v16 = vpop.f32.mrb[13].mxu0  ;;  %v5596_v47 = vpop.f32.mrb[13].mxu1  ;;  %v6069_v32 = vld [vmem:[%s7915_s7 + $0x18] sm:$0xff]  }
 0x3c5   : > { %v3017_v28 = vpop.f32.mrb[14].mxu0  ;;  %v3221_v29 = vpop.f32.mrb[14].mxu1 }
 0x3c6   : > { %v3225_v36 = vmax.f32 %v3021_v15, %v3218_v3  ;;  %v5517_v37 = vpop.f32.mrb[15].mxu0  ;;  %v5597_v39 = vpop.f32.mrb[15].mxu1 }
 0x3c8   : > { %v3233_v40 = vadd.f32 %v4498_v19, %v3225_v36 }
 0x3ca   : > { %v3234_v42 = vmax.f32 %v3233_v40, 0.0 }
 0x3cc   : > { %3236 = vst.msk [vmem:[#allocation3] sm:$0x3f] %vm3235_vm4, %v3234_v42 }
 0x3d3   : > { %v3251_v44 = vld [vmem:[#allocation3 + $0x1] sm:$0x1]  ;;  %v3237_v45 = vld [vmem:[#allocation3] sm:$0x1]  ;;  %v3423_v21 = vld [vmem:[#allocation3 + $0x2] sm:$0x1] }
 0x3d4   : > { %v3252_v2 = vpack.c.bf16 %v3251_v44, %v3251_v44  ;;  %v3238_v4 = vpack.c.bf16 %v3237_v45, %v3237_v45  ;;  %v3517_v22 = vld [vmem:[#allocation3 + $0x3] sm:$0x1]  ;;  %v3424_v25 = vpack.c.bf16 %v3423_v21, %v3423_v21  ;;  %v3611_v58 = vld [vmem:[#allocation3 + $0x4] sm:$0x1]  ;;  %v3705_v59 = vld [vmem:[#allocation3 + $0x5] sm:$0x1] }
 0x3d5   : > { %v3518_v17 = vpack.c.bf16 %v3517_v22, %v3517_v22  ;;  %v3612_v60 = vpack.c.bf16 %v3611_v58, %v3611_v58  ;;  %v3706_v61 = vpack.c.bf16 %v3705_v59, %v3705_v59 }
 0x3d6   : > { %5611 = vmatmul.mubr.msk.bf16.vlgmr.msra.gmra.mrb[16].mxu0 %vm1884_vm3, %v3252_v2  ;;  %5627 = vmatmul.mubr.msk.bf16.vlgmr.msra.gmra.mrb[16].mxu1 %vm1884_vm3, %v3238_v4 }
 0x3d7   : > { %5631 = vmatpush3.bf16.msra.mxu0 %v6042_v43  ;;  %5647 = vmatpush3.bf16.msra.mxu1 %v6043_v46 }
 0x3d8   : > { %5632 = vmatprep.subr.bf16.mxu0 %v6164_v1  ;;  %5648 = vmatprep.subr.bf16.mxu1 %v6164_v1 }
 0x3d9   : > { %5642 = vmatprep.mubr.msk.bf16.mxu0 %vm6165_vm0, %v6164_v1  ;;  %5658 = vmatprep.mubr.msk.bf16.mxu1 %vm6165_vm0, %v6164_v1 }
 0x3db   : > { %5633 = vmatpush3.bf16.msra.mxu0 %v6044_v5  ;;  %5649 = vmatpush3.bf16.msra.mxu1 %v6045_v6 }
 0x3dc   : > { %5634 = vmatprep.subr.bf16.mxu0 %v6164_v1  ;;  %5650 = vmatprep.subr.bf16.mxu1 %v6164_v1 }
 0x3df   : > { %5635 = vmatpush3.bf16.msra.mxu0 %v6046_v7  ;;  %5651 = vmatpush3.bf16.msra.mxu1 %v6047_v8 }
 0x3e0   : > { %5636 = vmatprep.subr.bf16.mxu0 %v6164_v1  ;;  %5652 = vmatprep.subr.bf16.mxu1 %v6164_v1 }
 0x3e3   : > { %5637 = vmatpush3.bf16.msra.mxu0 %v6048_v9  ;;  %5653 = vmatpush3.bf16.msra.mxu1 %v6049_v10  ;;  %v3799_v9 = vld [vmem:[%s7914_s6] sm:$0x1] }
 0x3e4   : > { %5638 = vmatprep.subr.bf16.mxu0 %v6164_v1  ;;  %5654 = vmatprep.subr.bf16.mxu1 %v6164_v1 }
 0x3e7   : > { %5639 = vmatpush3.bf16.msra.mxu0 %v6050_v12  ;;  %5655 = vmatpush3.bf16.msra.mxu1 %v6051_v13 }
 0x3e8   : > { %5640 = vmatprep.subr.bf16.mxu0 %v6164_v1  ;;  %5656 = vmatprep.subr.bf16.mxu1 %v6164_v1 }
 0x3eb   : > { %5641 = vmatpush3.bf16.msra.mxu0 %v6052_v14  ;;  %5657 = vmatpush3.bf16.msra.mxu1 %v6053_v20 }
 0x3ec   : > { %5662 = vmatprep.subr.bf16.mxu0 %v6164_v1  ;;  %5678 = vmatprep.subr.bf16.mxu1 %v6164_v1 }
 0x3ee   : > { %5643 = vmatmul.mubr.msk.bf16.vlgmr.msra.gmra.mrb[20].mxu0 %vm1884_vm3, %v3424_v25  ;;  %5659 = vmatmul.mubr.msk.bf16.vlgmr.msra.gmra.mrb[20].mxu1 %vm1884_vm3, %v3518_v17  ;;  %v6079_v25 = vld [vmem:[%s7917_s9 + $0x28] ss:$0 sps:$4 sm:$0x33]  }
 0x3ef   : > { %5663 = vmatpush3.bf16.msra.mxu0 %v6054_v23  ;;  %5679 = vmatpush3.bf16.msra.mxu1 %v6055_v24  ;;  %v6078_v24 = vld [vmem:[%s7917_s9 + $0x20] sm:$0xff]   ;;  %v3965_v17 = vsel %vm3963_vm7, %v6079_v25, 0 }
 0x3f0   : > { %5664 = vmatprep.subr.bf16.mxu0 %v6164_v1  ;;  %5680 = vmatprep.subr.bf16.mxu1 %v6164_v1 }
 0x3f1   : > { %5674 = vmatprep.mubr.msk.bf16.mxu0 %vm6165_vm0, %v6164_v1  ;;  %5690 = vmatprep.mubr.msk.bf16.mxu1 %vm6165_vm0, %v6164_v1 }
 0x3f3   : > { %5665 = vmatpush3.bf16.msra.mxu0 %v6056_v0  ;;  %5681 = vmatpush3.bf16.msra.mxu1 %v6057_v41  ;;  %v3818_v0 = vld [vmem:[%s7916_s8] sm:$0x1] }
 0x3f4   : > { %5666 = vmatprep.subr.bf16.mxu0 %v6164_v1  ;;  %5682 = vmatprep.subr.bf16.mxu1 %v6164_v1 }
 0x3f7   : > { %5667 = vmatpush3.bf16.msra.mxu0 %v6058_v11  ;;  %5683 = vmatpush3.bf16.msra.mxu1 %v6059_v30 }
 0x3f8   : > { %5668 = vmatprep.subr.bf16.mxu0 %v6164_v1  ;;  %5684 = vmatprep.subr.bf16.mxu1 %v6164_v1 }
 0x3fb   : > { %5669 = vmatpush3.bf16.msra.mxu0 %v6060_v31  ;;  %5685 = vmatpush3.bf16.msra.mxu1 %v6061_v49 }
 0x3fc   : > { %5670 = vmatprep.subr.bf16.mxu0 %v6164_v1  ;;  %5686 = vmatprep.subr.bf16.mxu1 %v6164_v1 }
 0x3ff   : > { %5671 = vmatpush3.bf16.msra.mxu0 %v6062_v52  ;;  %5687 = vmatpush3.bf16.msra.mxu1 %v6063_v54  ;;  %v3925_v54 = vld [vmem:[%s7918_s10] sm:$0x1] }
 0x400   : > { %5672 = vmatprep.subr.bf16.mxu0 %v6164_v1  ;;  %5688 = vmatprep.subr.bf16.mxu1 %v6164_v1 }
 0x403   : > { %5673 = vmatpush3.bf16.msra.mxu0 %v6064_v56  ;;  %5689 = vmatpush3.bf16.msra.mxu1 %v6065_v57 }
 0x404   : > { %5694 = vmatprep.subr.bf16.mxu0 %v6164_v1  ;;  %5714 = vmatprep.subr.bf16.mxu1 %v6164_v1 }
 0x406   : > { %5675 = vmatmul.mubr.msk.bf16.vlgmr.msra.gmra.mrb[24].mxu0 %vm1884_vm3, %v3612_v60  ;;  %5691 = vmatmul.mubr.msk.bf16.vlgmr.msra.gmra.mrb[24].mxu1 %vm1884_vm3, %v3706_v61 }
 0x407   : > { %5710 = vmatprep.mubr.msk.bf16.mxu0 %vm6165_vm0, %v6164_v1  ;;  %5726 = vmatprep.mubr.msk.bf16.mxu1 %vm6165_vm0, %v6164_v1 }
 0x408   : > { %5695 = vmatpush3.bf16.msra.mxu0 %v6066_v62  ;;  %5715 = vmatpush3.bf16.msra.mxu1 %v6074_v48 }
 0x409   : > { %5696 = vmatprep.subr.bf16.mxu0 %v6164_v1  ;;  %5716 = vmatprep.subr.bf16.mxu1 %v6164_v1 }
 0x40c   : > { %5697 = vmatpush3.bf16.msra.mxu0 %v6067_v26  ;;  %5717 = vmatpush3.bf16.msra.mxu1 %v6075_v51 }
 0x40d   : > { %5698 = vmatprep.subr.bf16.mxu0 %v6164_v1  ;;  %5718 = vmatprep.subr.bf16.mxu1 %v6164_v1 }
 0x410   : > { %5699 = vmatpush3.bf16.msra.mxu0 %v6068_v27  ;;  %5719 = vmatpush3.bf16.msra.mxu1 %v6076_v53 }
 0x411   : > { %5700 = vmatprep.subr.bf16.mxu0 %v6164_v1  ;;  %5720 = vmatprep.subr.bf16.mxu1 %v6164_v1 }
 0x414   : > { %5701 = vmatpush3.bf16.msra.mxu0 %v6069_v32  ;;  %5721 = vmatpush3.bf16.msra.mxu1 %v6077_v55 }
 0x415   : > { %5702 = vmatprep.subr.bf16.mxu0 %v6164_v1  ;;  %5722 = vmatprep.subr.bf16.mxu1 %v6164_v1 }
 0x418   : > { %5703 = vmatpush3.bf16.msra.mxu0 %v6070_v33  ;;  %5723 = vmatpush3.bf16.msra.mxu1 %v6078_v24 }
 0x419   : > { %5704 = vmatprep.subr.bf16.mxu0 %v6164_v1  ;;  %5724 = vmatprep.subr.bf16.mxu1 %v6164_v1 }
 0x41c   : > { %5705 = vmatpush3.bf16.msra.mxu0 %v6071_v34  ;;  %5725 = vmatpush3.bf16.msra.mxu1 %v3965_v17 }
 0x41d   : > { %5706 = vmatprep.subr.bf16.mxu0 %v6164_v1 }
 0x420   : > { %5707 = vmatpush3.bf16.msra.mxu0 %v6072_v35 }
 0x421   : > { %5708 = vmatprep.subr.bf16.mxu0 %v6164_v1 }
 0x424   : > { %5709 = vmatpush3.bf16.msra.mxu0 %v3870_v50 }
 0x4a9   : > { %v3338_v63 = vpop.f32.mrb[16].mxu0  ;;  %v3417_v18 = vpop.f32.mrb[16].mxu1 }
 0x4aa   : > { %v3418_v3 = vadd.f32 %v3417_v18, %v3338_v63  ;;  %v5612_v15 = vpop.f32.mrb[17].mxu0  ;;  %v5628_v16 = vpop.f32.mrb[17].mxu1 }
 0x4ab   : > { %v3341_v47 = vpop.f32.mrb[18].mxu0  ;;  %v3420_v19 = vpop.f32.mrb[18].mxu1 }
 0x4ac   : > { %v5613_v28 = vpop.f32.mrb[19].mxu0  ;;  %v5629_v29 = vpop.f32.mrb[19].mxu1 }
 0x4c1   : > { %v3510_v36 = vpop.f32.mrb[20].mxu0  ;;  %v3604_v37 = vpop.f32.mrb[20].mxu1 }
 0x4c2   : > { %v3516_v39 = vadd.f32 %v3510_v36, %v3418_v3  ;;  %v5644_v40 = vpop.f32.mrb[21].mxu0  ;;  %v5660_v42 = vpop.f32.mrb[21].mxu1 }
 0x4c3   : > { %v3513_v43 = vpop.f32.mrb[22].mxu0  ;;  %v3607_v44 = vpop.f32.mrb[22].mxu1 }
 0x4c4   : > { %v3610_v45 = vadd.f32 %v3604_v37, %v3516_v39  ;;  %v5645_v46 = vpop.f32.mrb[23].mxu0  ;;  %v5661_v2 = vpop.f32.mrb[23].mxu1 }
 0x4d9   : > { %v3698_v4 = vpop.f32.mrb[24].mxu0  ;;  %v3792_v5 = vpop.f32.mrb[24].mxu1 }
 0x4da   : > { %v3704_v6 = vadd.f32 %v3698_v4, %v3610_v45  ;;  %v5676_v7 = vpop.f32.mrb[25].mxu0  ;;  %v5692_v8 = vpop.f32.mrb[25].mxu1 }
 0x4db   : > { %v3701_v10 = vpop.f32.mrb[26].mxu0  ;;  %v3795_v12 = vpop.f32.mrb[26].mxu1 }
 0x4dc   : > { %v3798_v13 = vadd.f32 %v3792_v5, %v3704_v6  ;;  %v5677_v14 = vpop.f32.mrb[27].mxu0  ;;  %v5693_v20 = vpop.f32.mrb[27].mxu1 }
 0x4de   : > { %v3800_v21 = vadd.f32 %v3799_v9, %v3798_v13 }
 0x4e0   : > { %v3801_v22 = vmax.f32 %v3800_v21, 0.0 }
 0x4e2   : > { %v3802_v23 = vpack.c.bf16 %v3801_v22, %v3801_v22 }
 0x4e4   : > { %5711 = vmatmul.mubr.msk.bf16.vlgmr.msra.gmra.mrb[28].mxu0 %vm3864_vm6, %v3802_v23 }
 0x5b7   : > { %v3906_v41 = vpop.f32.mrb[28].mxu0 }
 0x5b8   : > { %v3907_v11 = vadd.f32 %v3906_v41, %v3818_v0  ;;  %v5712_v30 = vpop.f32.mrb[29].mxu0 }
 0x5b9   : > { %v3909_v31 = vpop.f32.mrb[30].mxu0 }
 0x5ba   : > { %v3912_v49 = vmax.f32 %v3907_v11, 0.0  ;;  %v5713_v52 = vpop.f32.mrb[31].mxu0 }
 0x5bc   : > { %v3913_v1 = vpack.c.bf16 %v3912_v49, %v3912_v49 }
 0x5be   : > { %5727 = vmatmul.mubr.msk.bf16.vlgmr.msra.gmra.mrb[28].mxu1 %vm3959_vm8, %v3913_v1 }
 0x691   : > { %v4001_v56 = vpop.f32.mrb[28].mxu1 }
 0x692   : > { %v4002_v57 = vadd.f32 %v4001_v56, %v3925_v54  ;;  %v5728_v58 = vpop.f32.mrb[29].mxu1 }
 0x693   : > { %v4004_v59 = vpop.f32.mrb[30].mxu1 }
 0x694   : > { %v5729_v60 = vpop.f32.mrb[31].mxu1  ;;  %4008 = vst.msk [vmem:[%s378_s12] sm:$0x1] %vm4007_vm9, %v4002_v57 }
 0x695   : > { %6113 = shalt.err (!%p6110_p3)
}
 0x696   : > { %s6114_s14 = scalar_lea.hbm %s7866_s15, 16  ;;  %s6118_s24 = scalar_lea.hbm %s7919_s11, 32 }
 0x697   : > { %p6115_p4 = scmp.ne.s32.totalorder %s7866_s15, %s6114_s14  ;;  %p6119_p9 = scmp.lt.u32.totalorder %s7866_s15, %s7919_s11 }
 0x698   : > { %p6120_p10 = scmp.lt.u32.totalorder %s6118_s24, %s6114_s14  ;;  %p6122_p12 = scmp.lt.u32.totalorder %s6114_s14, %s7866_s15 }
 0x699   : > { %p6116_p7 = pnand %p6115_p4, %p6265_p5 }
 0x69a   : > { %p6121_p11 = por %p6120_p10, %p6119_p9 }
 0x69b   : > { %p6117_p8 = pneg %p6116_p7 }
 0x69c   : > { %p6123_p13 = por %p6122_p12, %p6121_p11 }
 0x69e   : > { %p6124_p0 = pnand %p6123_p13, %p6117_p8 }
 0x6a0   : > { %6127 = shalt.err (!%p6124_p0)
}
 0x6a1   : > { %5859 = dma.vmem_to_hbm [thread:$0]  (%p6265_p5), %s7868_s13, 16, %s7866_s15, %s4010_s21  }
 0x6a2 PF: > { %p5865_p1 = scmp.ge.s32.totalorder %s6162_s20, 2  ;;  %s4034_s16 = sand.u32 1, %s6150_s17  }
 0x6a3   : > { %s4035_s22 = scalar_lea.sflag [#allocation5], %s4034_s16 }
 0x6a4   : > { %p5862_p2 = pnand %p5865_p1, %p6269_p6 }
 0x6a6   : > { %6145 = dma.done.wait (!%p5862_p2), %s4035_s22, 16  }
 0x6a7   : > { %6147 = vsyncadd (!%p5862_p2), %s4035_s22, 4294967280  ;;  %p21_p3 = scmp.ge.s32.totalorder %s6252_s23, 4   ;;  %s7930_s17 = smov %s6154_s18 }
 0x6a8   : > { %s7931_s18 = smov %s6158_s19  ;;  %s7932_s19 = smov %s6263_s26 }
 0x6a9   : > { %s7933_s20 = smov %s6252_s23  ;;  %23 = sbr.rel (!%p21_p3) target bundleno = 5 (0x5), region = 133 }
 0x6b0   :  { %4039 = vsyncpa [#allocation5], 1 }
 0x6b1   :  { %4041 = vsyncpa [#allocation5 + $0x1], 1 }

</bundles_post_ra>
